<compile_context>
chip_gen: v5e
topology: v5e:2x2
jax: 0.10.0
libtpu: 0.0.40
codegen_flags: <defaults>
</compile_context>

<pallas_src>
import functools

import jax
import jax.numpy as jnp
from jax import lax
from jax.experimental import pallas as pl
from jax.experimental.pallas import tpu as pltpu

_SUB = 8
_LANES = 128
_GROUP = _SUB * _LANES  # 1024 batch elements per (8, 128) vreg group


def _qlayer_kernel(w_ref, theta_ref, x_ref, rho_ref, out_ref, *, D, TG):
    # x_ref   : (TG, D, 8, 128) f32   x[g, j, s, l] = x[batch = g*1024 + s*128 + l, j]
    # rho_ref : (TG, 8, 8, 128) f32   rows 0..3 = Re(rho[m,n]) at 2m+n, rows 4..7 = Im
    # out_ref : (TG, 8, 8, 128) f32   same packing
    # w_ref   : (3, D) f32 SMEM, theta_ref: (3,) f32 SMEM
    #
    # Bottleneck note: ~76 B/element of HBM traffic vs ~6 EUP + ~140 VPU ops/elem,
    # so the kernel is HBM-bandwidth-bound on v5e/v6e/v7x; trig cost is hidden.

    def cmul(u, v):
        ur, ui = u
        vr, vi = v
        return ur * vr - ui * vi, ur * vi + ui * vr

    def cadd(u, v):
        return u[0] + v[0], u[1] + v[1]

    def body(g, carry):
        x = x_ref[g]      # (D, 8, 128)
        rho = rho_ref[g]  # (8, 8, 128)

        # phi_i = theta_i + sum_j w[i, j] * x[j]  -- VPU broadcast FMAs (D is tiny).
        # TODO(synk): for D >= ~64 move this to an MXU matmul instead.
        phi = []
        for i in range(3):
            acc = theta_ref[i] + x[0] * w_ref[i, 0]
            for j in range(1, D):
                acc = acc + x[j] * w_ref[i, j]
            phi.append(acc)
        p0, p1, p2 = phi

        half = 0.5 * p0
        a = 0.5 * (p1 + p2)
        b = 0.5 * (p1 - p2)
        ch, sh = jnp.cos(half), jnp.sin(half)
        ca, sa = jnp.cos(a), jnp.sin(a)
        cb, sb = jnp.cos(b), jnp.sin(b)

        # U as (re, im) pairs, each (8, 128)
        U = {
            (0, 0): (ch * ca, ch * sa),     #  cos(p0/2) * exp(+i a)
            (0, 1): (-sh * cb, -sh * sb),   # -sin(p0/2) * exp(+i b)
            (1, 0): (sh * cb, -sh * sb),    #  sin(p0/2) * exp(-i b)
            (1, 1): (ch * ca, -ch * sa),    #  cos(p0/2) * exp(-i a)
        }
        R = {(m, n): (rho[2 * m + n], rho[4 + 2 * m + n])
             for m in range(2) for n in range(2)}

        # T[i, n] = sum_m U[i, m] * rho[m, n]            (8 cmul)
        T = {}
        for i in range(2):
            for n in range(2):
                T[(i, n)] = cadd(cmul(U[(i, 0)], R[(0, n)]),
                                 cmul(U[(i, 1)], R[(1, n)]))

        # out[i, j] = sum_n T[i, n] * conj(U[j, n])      (8 cmul)
        for i in range(2):
            for j in range(2):
                u0r, u0i = U[(j, 0)]
                u1r, u1i = U[(j, 1)]
                o = cadd(cmul(T[(i, 0)], (u0r, -u0i)),
                         cmul(T[(i, 1)], (u1r, -u1i)))
                out_ref[g, 2 * i + j, :, :] = o[0]       # Re
                out_ref[g, 4 + 2 * i + j, :, :] = o[1]   # Im
        return carry

    unroll = 2 if (TG >= 2 and TG % 2 == 0) else 1
    lax.fori_loop(0, TG, body, 0, unroll=unroll)


def _qlayer_packed(x_pack, rho_pack, w, theta, *, TG):
    """Packed-in / packed-out variant: keeps rho in the (G, 8, 8, 128) f32 layout
    so successive QLayer applications never pay the pack/unpack HBM passes."""
    G_total, D = x_pack.shape[0], x_pack.shape[1]
    grid_r = G_total // TG
    Bp = G_total * _GROUP
    kernel = functools.partial(_qlayer_kernel, D=D, TG=TG)
    return pl.pallas_call(
        kernel,
        out_shape=jax.ShapeDtypeStruct((G_total, 8, _SUB, _LANES), jnp.float32),
        grid=(grid_r,),
        in_specs=[
            pl.BlockSpec(memory_space=pltpu.MemorySpace.SMEM),            # w (3, D)
            pl.BlockSpec(memory_space=pltpu.MemorySpace.SMEM),            # theta (3,)
            pl.BlockSpec((TG, D, _SUB, _LANES), lambda i: (i, 0, 0, 0)),  # x_pack
            pl.BlockSpec((TG, 8, _SUB, _LANES), lambda i: (i, 0, 0, 0)),  # rho_pack
        ],
        out_specs=pl.BlockSpec((TG, 8, _SUB, _LANES), lambda i: (i, 0, 0, 0)),
        compiler_params=pltpu.CompilerParams(
            dimension_semantics=("parallel",)),
        cost_estimate=pl.CostEstimate(
            flops=140 * Bp,
            transcendentals=6 * Bp,
            bytes_accessed=(D + 16) * Bp * 4),
    )(w.astype(jnp.float32), theta.astype(jnp.float32), x_pack, rho_pack)


def _choose_tiling(B, tile_groups):
    """Pick (groups per tile, total padded groups). Every slab is a full (8,128)
    vreg; when the batch fits one tile but spans >= 2 groups we still emit 2
    'parallel' grid steps so both v7x TensorCores get work."""
    groups_needed = max(1, pl.cdiv(B, _GROUP))
    if groups_needed <= tile_groups:
        if groups_needed >= 2:
            TG = pl.cdiv(groups_needed, 2)
            G_total = 2 * TG
        else:
            TG = groups_needed
            G_total = groups_needed
    else:
        TG = tile_groups
        G_total = TG * pl.cdiv(groups_needed, TG)
    return TG, G_total


@functools.partial(jax.jit, static_argnames=("tile_groups",))
def qlayer_forward(rho, x, w, theta, *, tile_groups=64):
    """rho: (B, 2, 2) complex64, x: (B, D) f32, w: (3, D) f32, theta: (3,) f32.

    tile_groups=64 -> 512 batch-rows per grid step (~10 MiB double-buffered at
    D=3): fits v5e's 16 MiB default scoped VMEM and v6e/v7x's 32 MiB.
    """
    B, D = x.shape
    TG, G_total = _choose_tiling(B, tile_groups)
    Bp = G_total * _GROUP

    # Pack (fused into the surrounding graph by jit; no separate HBM passes).
    xf = x.astype(jnp.float32)
    rho_c = rho.astype(jnp.complex64).reshape(B, 4)                 # col = 2m + n
    rho_ri = jnp.concatenate(
        [jnp.real(rho_c), jnp.imag(rho_c)], axis=1).astype(jnp.float32)  # (B, 8)
    if Bp != B:
        xf = jnp.pad(xf, ((0, Bp - B), (0, 0)))
        rho_ri = jnp.pad(rho_ri, ((0, Bp - B), (0, 0)))
    x_pack = xf.reshape(G_total, _SUB, _LANES, D).transpose(0, 3, 1, 2)
    rho_pack = rho_ri.reshape(G_total, _SUB, _LANES, 8).transpose(0, 3, 1, 2)

    out_pack = _qlayer_packed(x_pack, rho_pack, w, theta, TG=TG)

    out_ri = out_pack.transpose(0, 2, 3, 1).reshape(Bp, 8)[:B]      # (B, 8)
    out = (out_ri[:, :4] + 1j * out_ri[:, 4:]).astype(jnp.complex64)
    return out.reshape(B, 2, 2)


def _reference_forward(rho, x, w, theta):
    """Pure-JAX reference mirroring the PyTorch module exactly."""
    phi = theta[None, :] + jnp.einsum('ij,bj->bi', w, x)            # (B, 3)
    half = phi[:, 0] / 2
    a = (phi[:, 1] + phi[:, 2]) / 2
    b = (phi[:, 1] - phi[:, 2]) / 2
    U00 = jnp.cos(half) * jnp.exp(1j * a)
    U01 = -jnp.sin(half) * jnp.exp(1j * b)
    U10 = jnp.sin(half) * jnp.exp(-1j * b)
    U11 = jnp.cos(half) * jnp.exp(-1j * a)
    U = jnp.stack([jnp.stack([U00, U01], axis=-1),
                   jnp.stack([U10, U11], axis=-1)], axis=-2)        # (B, 2, 2)
    return jnp.einsum('bim,bmn,bjn->bij', U, rho.astype(jnp.complex64), jnp.conj(U))


if __name__ == "__main__":
    key = jax.random.PRNGKey(0)

    # (8, 3) matches the module default; (133, 5) exercises padding & larger D;
    # (3000, 4) exercises the 2-step parallel grid; (2600, 3, tile_groups=1)
    # exercises the multi-tile (large-batch) code path with small data.
    cases = [(8, 3, 64), (133, 5, 64), (3000, 4, 64), (2600, 3, 1)]
    for (B, D, tg) in cases:
        k_w, k_t, k_x, k_rr, k_ri, key = jax.random.split(key, 6)

        w = jax.random.normal(k_w, (3, D), dtype=jnp.float32) * jnp.sqrt(2.0 / D)
        theta = 0.1 * jax.random.normal(k_t, (3,), dtype=jnp.float32)
        x = jax.random.normal(k_x, (B, D), dtype=jnp.float32)
        rho = (jax.random.normal(k_rr, (B, 2, 2), dtype=jnp.float32)
               + 1j * jax.random.normal(k_ri, (B, 2, 2), dtype=jnp.float32)
               ).astype(jnp.complex64)

        out = jax.block_until_ready(qlayer_forward(rho, x, w, theta, tile_groups=tg))
        ref = _reference_forward(rho, x, w, theta)

        assert out.shape == (B, 2, 2) and out.dtype == jnp.complex64
        err = jnp.max(jnp.abs(out - ref))
        assert jnp.allclose(out, ref, atol=1e-4, rtol=1e-4), (
            f"mismatch at B={B}, D={D}: max err {err}")

    print("KERNEL_OK")
</pallas_src>

<mosaic_0001>
module attributes {stable_mosaic.version = 11 : i64} {
  func.func @_qlayer_kernel(%arg0: i32, %arg1: memref<3x3xf32, #tpu.memory_space<smem>>, %arg2: memref<3xf32, #tpu.memory_space<smem>>, %arg3: memref<1x3x8x128xf32, #tpu.memory_space<vmem>>, %arg4: memref<1x8x8x128xf32, #tpu.memory_space<vmem>>, %arg5: memref<1x8x8x128xf32, #tpu.memory_space<vmem>>) attributes {dimension_semantics = [#tpu.dimension_semantics<parallel>], iteration_bounds = array<i64: 1>, scalar_prefetch = 0 : i64, scratch_operands = 0 : i64, tpu.core_type = #tpu.core_type<tc>, window_params = [{transform_indices = @transform_0, window_bounds = array<i64: 3, 3>}, {transform_indices = @transform_1, window_bounds = array<i64: 3>}, {transform_indices = @transform_2, window_bounds = array<i64: 1, 3, 8, 128>}, {transform_indices = @transform_3, window_bounds = array<i64: 1, 8, 8, 128>}, {transform_indices = @transform_4, window_bounds = array<i64: 1, 8, 8, 128>}]} {
    %c0_i32 = arith.constant 0 : i32
    %0 = arith.index_cast %c0_i32 : i32 to index
    %c0 = arith.constant 0 : index
    %c0_0 = arith.constant 0 : index
    %c0_1 = arith.constant 0 : index
    %1 = vector.load %arg3[%0, %c0, %c0_0, %c0_1] : memref<1x3x8x128xf32, #tpu.memory_space<vmem>>, vector<1x3x8x128xf32>
    %2 = vector.shape_cast %1 : vector<1x3x8x128xf32> to vector<3x8x128xf32>
    %3 = arith.index_cast %c0_i32 : i32 to index
    %c0_2 = arith.constant 0 : index
    %c0_3 = arith.constant 0 : index
    %c0_4 = arith.constant 0 : index
    %4 = vector.load %arg4[%3, %c0_2, %c0_3, %c0_4] : memref<1x8x8x128xf32, #tpu.memory_space<vmem>>, vector<1x8x8x128xf32>
    %5 = vector.shape_cast %4 : vector<1x8x8x128xf32> to vector<8x8x128xf32>
    %c0_5 = arith.constant 0 : index
    %6 = memref.load %arg2[%c0_5] : memref<3xf32, #tpu.memory_space<smem>>
    %7 = vector.extract_strided_slice %2 {offsets = [0, 0, 0], sizes = [1, 8, 128], strides = [1, 1, 1]} : vector<3x8x128xf32> to vector<1x8x128xf32>
    %8 = vector.shape_cast %7 : vector<1x8x128xf32> to vector<8x128xf32>
    %c0_6 = arith.constant 0 : index
    %c0_7 = arith.constant 0 : index
    %9 = memref.load %arg1[%c0_6, %c0_7] : memref<3x3xf32, #tpu.memory_space<smem>>
    %10 = vector.broadcast %9 : f32 to vector<8x128xf32>
    %11 = arith.mulf %8, %10 : vector<8x128xf32>
    %12 = vector.broadcast %6 : f32 to vector<8x128xf32>
    %13 = arith.addf %12, %11 : vector<8x128xf32>
    %14 = vector.extract_strided_slice %2 {offsets = [1, 0, 0], sizes = [1, 8, 128], strides = [1, 1, 1]} : vector<3x8x128xf32> to vector<1x8x128xf32>
    %15 = vector.shape_cast %14 : vector<1x8x128xf32> to vector<8x128xf32>
    %c0_8 = arith.constant 0 : index
    %c1 = arith.constant 1 : index
    %16 = memref.load %arg1[%c0_8, %c1] : memref<3x3xf32, #tpu.memory_space<smem>>
    %17 = vector.broadcast %16 : f32 to vector<8x128xf32>
    %18 = arith.mulf %15, %17 : vector<8x128xf32>
    %19 = arith.addf %13, %18 : vector<8x128xf32>
    %20 = vector.extract_strided_slice %2 {offsets = [2, 0, 0], sizes = [1, 8, 128], strides = [1, 1, 1]} : vector<3x8x128xf32> to vector<1x8x128xf32>
    %21 = vector.shape_cast %20 : vector<1x8x128xf32> to vector<8x128xf32>
    %c0_9 = arith.constant 0 : index
    %c2 = arith.constant 2 : index
    %22 = memref.load %arg1[%c0_9, %c2] : memref<3x3xf32, #tpu.memory_space<smem>>
    %23 = vector.broadcast %22 : f32 to vector<8x128xf32>
    %24 = arith.mulf %21, %23 : vector<8x128xf32>
    %25 = arith.addf %19, %24 : vector<8x128xf32>
    %c1_10 = arith.constant 1 : index
    %26 = memref.load %arg2[%c1_10] : memref<3xf32, #tpu.memory_space<smem>>
    %27 = vector.extract_strided_slice %2 {offsets = [0, 0, 0], sizes = [1, 8, 128], strides = [1, 1, 1]} : vector<3x8x128xf32> to vector<1x8x128xf32>
    %28 = vector.shape_cast %27 : vector<1x8x128xf32> to vector<8x128xf32>
    %c1_11 = arith.constant 1 : index
    %c0_12 = arith.constant 0 : index
    %29 = memref.load %arg1[%c1_11, %c0_12] : memref<3x3xf32, #tpu.memory_space<smem>>
    %30 = vector.broadcast %29 : f32 to vector<8x128xf32>
    %31 = arith.mulf %28, %30 : vector<8x128xf32>
    %32 = vector.broadcast %26 : f32 to vector<8x128xf32>
    %33 = arith.addf %32, %31 : vector<8x128xf32>
    %34 = vector.extract_strided_slice %2 {offsets = [1, 0, 0], sizes = [1, 8, 128], strides = [1, 1, 1]} : vector<3x8x128xf32> to vector<1x8x128xf32>
    %35 = vector.shape_cast %34 : vector<1x8x128xf32> to vector<8x128xf32>
    %c1_13 = arith.constant 1 : index
    %c1_14 = arith.constant 1 : index
    %36 = memref.load %arg1[%c1_13, %c1_14] : memref<3x3xf32, #tpu.memory_space<smem>>
    %37 = vector.broadcast %36 : f32 to vector<8x128xf32>
    %38 = arith.mulf %35, %37 : vector<8x128xf32>
    %39 = arith.addf %33, %38 : vector<8x128xf32>
    %40 = vector.extract_strided_slice %2 {offsets = [2, 0, 0], sizes = [1, 8, 128], strides = [1, 1, 1]} : vector<3x8x128xf32> to vector<1x8x128xf32>
    %41 = vector.shape_cast %40 : vector<1x8x128xf32> to vector<8x128xf32>
    %c1_15 = arith.constant 1 : index
    %c2_16 = arith.constant 2 : index
    %42 = memref.load %arg1[%c1_15, %c2_16] : memref<3x3xf32, #tpu.memory_space<smem>>
    %43 = vector.broadcast %42 : f32 to vector<8x128xf32>
    %44 = arith.mulf %41, %43 : vector<8x128xf32>
    %45 = arith.addf %39, %44 : vector<8x128xf32>
    %c2_17 = arith.constant 2 : index
    %46 = memref.load %arg2[%c2_17] : memref<3xf32, #tpu.memory_space<smem>>
    %47 = vector.extract_strided_slice %2 {offsets = [0, 0, 0], sizes = [1, 8, 128], strides = [1, 1, 1]} : vector<3x8x128xf32> to vector<1x8x128xf32>
    %48 = vector.shape_cast %47 : vector<1x8x128xf32> to vector<8x128xf32>
    %c2_18 = arith.constant 2 : index
    %c0_19 = arith.constant 0 : index
    %49 = memref.load %arg1[%c2_18, %c0_19] : memref<3x3xf32, #tpu.memory_space<smem>>
    %50 = vector.broadcast %49 : f32 to vector<8x128xf32>
    %51 = arith.mulf %48, %50 : vector<8x128xf32>
    %52 = vector.broadcast %46 : f32 to vector<8x128xf32>
    %53 = arith.addf %52, %51 : vector<8x128xf32>
    %54 = vector.extract_strided_slice %2 {offsets = [1, 0, 0], sizes = [1, 8, 128], strides = [1, 1, 1]} : vector<3x8x128xf32> to vector<1x8x128xf32>
    %55 = vector.shape_cast %54 : vector<1x8x128xf32> to vector<8x128xf32>
    %c2_20 = arith.constant 2 : index
    %c1_21 = arith.constant 1 : index
    %56 = memref.load %arg1[%c2_20, %c1_21] : memref<3x3xf32, #tpu.memory_space<smem>>
    %57 = vector.broadcast %56 : f32 to vector<8x128xf32>
    %58 = arith.mulf %55, %57 : vector<8x128xf32>
    %59 = arith.addf %53, %58 : vector<8x128xf32>
    %60 = vector.extract_strided_slice %2 {offsets = [2, 0, 0], sizes = [1, 8, 128], strides = [1, 1, 1]} : vector<3x8x128xf32> to vector<1x8x128xf32>
    %61 = vector.shape_cast %60 : vector<1x8x128xf32> to vector<8x128xf32>
    %c2_22 = arith.constant 2 : index
    %c2_23 = arith.constant 2 : index
    %62 = memref.load %arg1[%c2_22, %c2_23] : memref<3x3xf32, #tpu.memory_space<smem>>
    %63 = vector.broadcast %62 : f32 to vector<8x128xf32>
    %64 = arith.mulf %61, %63 : vector<8x128xf32>
    %65 = arith.addf %59, %64 : vector<8x128xf32>
    %cst = arith.constant 5.000000e-01 : f32
    %66 = vector.broadcast %cst : f32 to vector<8x128xf32>
    %67 = arith.mulf %66, %25 : vector<8x128xf32>
    %68 = arith.addf %45, %65 : vector<8x128xf32>
    %cst_24 = arith.constant 5.000000e-01 : f32
    %69 = vector.broadcast %cst_24 : f32 to vector<8x128xf32>
    %70 = arith.mulf %69, %68 : vector<8x128xf32>
    %71 = arith.subf %45, %65 : vector<8x128xf32>
    %cst_25 = arith.constant 5.000000e-01 : f32
    %72 = vector.broadcast %cst_25 : f32 to vector<8x128xf32>
    %73 = arith.mulf %72, %71 : vector<8x128xf32>
    %74 = math.cos %67 : vector<8x128xf32>
    %75 = math.sin %67 : vector<8x128xf32>
    %76 = math.cos %70 : vector<8x128xf32>
    %77 = math.sin %70 : vector<8x128xf32>
    %78 = math.cos %73 : vector<8x128xf32>
    %79 = math.sin %73 : vector<8x128xf32>
    %80 = arith.mulf %74, %76 : vector<8x128xf32>
    %81 = arith.mulf %74, %77 : vector<8x128xf32>
    %cst_26 = arith.constant 0.000000e+00 : f32
    %82 = vector.broadcast %cst_26 : f32 to vector<8x128xf32>
    %83 = arith.subf %82, %75 : vector<8x128xf32>
    %84 = arith.mulf %83, %78 : vector<8x128xf32>
    %cst_27 = arith.constant 0.000000e+00 : f32
    %85 = vector.broadcast %cst_27 : f32 to vector<8x128xf32>
    %86 = arith.subf %85, %75 : vector<8x128xf32>
    %87 = arith.mulf %86, %79 : vector<8x128xf32>
    %88 = arith.mulf %75, %78 : vector<8x128xf32>
    %cst_28 = arith.constant 0.000000e+00 : f32
    %89 = vector.broadcast %cst_28 : f32 to vector<8x128xf32>
    %90 = arith.subf %89, %75 : vector<8x128xf32>
    %91 = arith.mulf %90, %79 : vector<8x128xf32>
    %92 = arith.mulf %74, %76 : vector<8x128xf32>
    %cst_29 = arith.constant 0.000000e+00 : f32
    %93 = vector.broadcast %cst_29 : f32 to vector<8x128xf32>
    %94 = arith.subf %93, %74 : vector<8x128xf32>
    %95 = arith.mulf %94, %77 : vector<8x128xf32>
    %96 = vector.extract_strided_slice %5 {offsets = [0, 0, 0], sizes = [1, 8, 128], strides = [1, 1, 1]} : vector<8x8x128xf32> to vector<1x8x128xf32>
    %97 = vector.shape_cast %96 : vector<1x8x128xf32> to vector<8x128xf32>
    %98 = vector.extract_strided_slice %5 {offsets = [4, 0, 0], sizes = [1, 8, 128], strides = [1, 1, 1]} : vector<8x8x128xf32> to vector<1x8x128xf32>
    %99 = vector.shape_cast %98 : vector<1x8x128xf32> to vector<8x128xf32>
    %100 = vector.extract_strided_slice %5 {offsets = [1, 0, 0], sizes = [1, 8, 128], strides = [1, 1, 1]} : vector<8x8x128xf32> to vector<1x8x128xf32>
    %101 = vector.shape_cast %100 : vector<1x8x128xf32> to vector<8x128xf32>
    %102 = vector.extract_strided_slice %5 {offsets = [5, 0, 0], sizes = [1, 8, 128], strides = [1, 1, 1]} : vector<8x8x128xf32> to vector<1x8x128xf32>
    %103 = vector.shape_cast %102 : vector<1x8x128xf32> to vector<8x128xf32>
    %104 = vector.extract_strided_slice %5 {offsets = [2, 0, 0], sizes = [1, 8, 128], strides = [1, 1, 1]} : vector<8x8x128xf32> to vector<1x8x128xf32>
    %105 = vector.shape_cast %104 : vector<1x8x128xf32> to vector<8x128xf32>
    %106 = vector.extract_strided_slice %5 {offsets = [6, 0, 0], sizes = [1, 8, 128], strides = [1, 1, 1]} : vector<8x8x128xf32> to vector<1x8x128xf32>
    %107 = vector.shape_cast %106 : vector<1x8x128xf32> to vector<8x128xf32>
    %108 = vector.extract_strided_slice %5 {offsets = [3, 0, 0], sizes = [1, 8, 128], strides = [1, 1, 1]} : vector<8x8x128xf32> to vector<1x8x128xf32>
    %109 = vector.shape_cast %108 : vector<1x8x128xf32> to vector<8x128xf32>
    %110 = vector.extract_strided_slice %5 {offsets = [7, 0, 0], sizes = [1, 8, 128], strides = [1, 1, 1]} : vector<8x8x128xf32> to vector<1x8x128xf32>
    %111 = vector.shape_cast %110 : vector<1x8x128xf32> to vector<8x128xf32>
    %112 = arith.mulf %80, %97 : vector<8x128xf32>
    %113 = arith.mulf %81, %99 : vector<8x128xf32>
    %114 = arith.subf %112, %113 : vector<8x128xf32>
    %115 = arith.mulf %80, %99 : vector<8x128xf32>
    %116 = arith.mulf %81, %97 : vector<8x128xf32>
    %117 = arith.addf %115, %116 : vector<8x128xf32>
    %118 = arith.mulf %84, %105 : vector<8x128xf32>
    %119 = arith.mulf %87, %107 : vector<8x128xf32>
    %120 = arith.subf %118, %119 : vector<8x128xf32>
    %121 = arith.mulf %84, %107 : vector<8x128xf32>
    %122 = arith.mulf %87, %105 : vector<8x128xf32>
    %123 = arith.addf %121, %122 : vector<8x128xf32>
    %124 = arith.addf %114, %120 : vector<8x128xf32>
    %125 = arith.addf %117, %123 : vector<8x128xf32>
    %126 = arith.mulf %80, %101 : vector<8x128xf32>
    %127 = arith.mulf %81, %103 : vector<8x128xf32>
    %128 = arith.subf %126, %127 : vector<8x128xf32>
    %129 = arith.mulf %80, %103 : vector<8x128xf32>
    %130 = arith.mulf %81, %101 : vector<8x128xf32>
    %131 = arith.addf %129, %130 : vector<8x128xf32>
    %132 = arith.mulf %84, %109 : vector<8x128xf32>
    %133 = arith.mulf %87, %111 : vector<8x128xf32>
    %134 = arith.subf %132, %133 : vector<8x128xf32>
    %135 = arith.mulf %84, %111 : vector<8x128xf32>
    %136 = arith.mulf %87, %109 : vector<8x128xf32>
    %137 = arith.addf %135, %136 : vector<8x128xf32>
    %138 = arith.addf %128, %134 : vector<8x128xf32>
    %139 = arith.addf %131, %137 : vector<8x128xf32>
    %140 = arith.mulf %88, %97 : vector<8x128xf32>
    %141 = arith.mulf %91, %99 : vector<8x128xf32>
    %142 = arith.subf %140, %141 : vector<8x128xf32>
    %143 = arith.mulf %88, %99 : vector<8x128xf32>
    %144 = arith.mulf %91, %97 : vector<8x128xf32>
    %145 = arith.addf %143, %144 : vector<8x128xf32>
    %146 = arith.mulf %92, %105 : vector<8x128xf32>
    %147 = arith.mulf %95, %107 : vector<8x128xf32>
    %148 = arith.subf %146, %147 : vector<8x128xf32>
    %149 = arith.mulf %92, %107 : vector<8x128xf32>
    %150 = arith.mulf %95, %105 : vector<8x128xf32>
    %151 = arith.addf %149, %150 : vector<8x128xf32>
    %152 = arith.addf %142, %148 : vector<8x128xf32>
    %153 = arith.addf %145, %151 : vector<8x128xf32>
    %154 = arith.mulf %88, %101 : vector<8x128xf32>
    %155 = arith.mulf %91, %103 : vector<8x128xf32>
    %156 = arith.subf %154, %155 : vector<8x128xf32>
    %157 = arith.mulf %88, %103 : vector<8x128xf32>
    %158 = arith.mulf %91, %101 : vector<8x128xf32>
    %159 = arith.addf %157, %158 : vector<8x128xf32>
    %160 = arith.mulf %92, %109 : vector<8x128xf32>
    %161 = arith.mulf %95, %111 : vector<8x128xf32>
    %162 = arith.subf %160, %161 : vector<8x128xf32>
    %163 = arith.mulf %92, %111 : vector<8x128xf32>
    %164 = arith.mulf %95, %109 : vector<8x128xf32>
    %165 = arith.addf %163, %164 : vector<8x128xf32>
    %166 = arith.addf %156, %162 : vector<8x128xf32>
    %167 = arith.addf %159, %165 : vector<8x128xf32>
    %cst_30 = arith.constant 0.000000e+00 : f32
    %168 = vector.broadcast %cst_30 : f32 to vector<8x128xf32>
    %169 = arith.subf %168, %81 : vector<8x128xf32>
    %170 = arith.mulf %124, %80 : vector<8x128xf32>
    %171 = arith.mulf %125, %169 : vector<8x128xf32>
    %172 = arith.subf %170, %171 : vector<8x128xf32>
    %173 = arith.mulf %124, %169 : vector<8x128xf32>
    %174 = arith.mulf %125, %80 : vector<8x128xf32>
    %175 = arith.addf %173, %174 : vector<8x128xf32>
    %cst_31 = arith.constant 0.000000e+00 : f32
    %176 = vector.broadcast %cst_31 : f32 to vector<8x128xf32>
    %177 = arith.subf %176, %87 : vector<8x128xf32>
    %178 = arith.mulf %138, %84 : vector<8x128xf32>
    %179 = arith.mulf %139, %177 : vector<8x128xf32>
    %180 = arith.subf %178, %179 : vector<8x128xf32>
    %181 = arith.mulf %138, %177 : vector<8x128xf32>
    %182 = arith.mulf %139, %84 : vector<8x128xf32>
    %183 = arith.addf %181, %182 : vector<8x128xf32>
    %184 = arith.addf %172, %180 : vector<8x128xf32>
    %185 = arith.addf %175, %183 : vector<8x128xf32>
    %186 = arith.index_cast %c0_i32 : i32 to index
    %c0_32 = arith.constant 0 : index
    %c0_33 = arith.constant 0 : index
    %c0_34 = arith.constant 0 : index
    %187 = vector.load %arg5[%186, %c0_32, %c0_33, %c0_34] : memref<1x8x8x128xf32, #tpu.memory_space<vmem>>, vector<1x1x8x128xf32>
    %188 = vector.shape_cast %187 : vector<1x1x8x128xf32> to vector<8x128xf32>
    %189 = vector.shape_cast %184 : vector<8x128xf32> to vector<1x1x8x128xf32>
    tpu.vector_store %arg5[%186, %c0_32, %c0_33, %c0_34], %189 {strides = array<i32>} : memref<1x8x8x128xf32, #tpu.memory_space<vmem>>, vector<1x1x8x128xf32>,
    %190 = arith.index_cast %c0_i32 : i32 to index
    %c4 = arith.constant 4 : index
    %c0_35 = arith.constant 0 : index
    %c0_36 = arith.constant 0 : index
    %191 = vector.load %arg5[%190, %c4, %c0_35, %c0_36] : memref<1x8x8x128xf32, #tpu.memory_space<vmem>>, vector<1x1x8x128xf32>
    %192 = vector.shape_cast %191 : vector<1x1x8x128xf32> to vector<8x128xf32>
    %193 = vector.shape_cast %185 : vector<8x128xf32> to vector<1x1x8x128xf32>
    tpu.vector_store %arg5[%190, %c4, %c0_35, %c0_36], %193 {strides = array<i32>} : memref<1x8x8x128xf32, #tpu.memory_space<vmem>>, vector<1x1x8x128xf32>,
    %cst_37 = arith.constant 0.000000e+00 : f32
    %194 = vector.broadcast %cst_37 : f32 to vector<8x128xf32>
    %195 = arith.subf %194, %91 : vector<8x128xf32>
    %196 = arith.mulf %124, %88 : vector<8x128xf32>
    %197 = arith.mulf %125, %195 : vector<8x128xf32>
    %198 = arith.subf %196, %197 : vector<8x128xf32>
    %199 = arith.mulf %124, %195 : vector<8x128xf32>
    %200 = arith.mulf %125, %88 : vector<8x128xf32>
    %201 = arith.addf %199, %200 : vector<8x128xf32>
    %cst_38 = arith.constant 0.000000e+00 : f32
    %202 = vector.broadcast %cst_38 : f32 to vector<8x128xf32>
    %203 = arith.subf %202, %95 : vector<8x128xf32>
    %204 = arith.mulf %138, %92 : vector<8x128xf32>
    %205 = arith.mulf %139, %203 : vector<8x128xf32>
    %206 = arith.subf %204, %205 : vector<8x128xf32>
    %207 = arith.mulf %138, %203 : vector<8x128xf32>
    %208 = arith.mulf %139, %92 : vector<8x128xf32>
    %209 = arith.addf %207, %208 : vector<8x128xf32>
    %210 = arith.addf %198, %206 : vector<8x128xf32>
    %211 = arith.addf %201, %209 : vector<8x128xf32>
    %212 = arith.index_cast %c0_i32 : i32 to index
    %c1_39 = arith.constant 1 : index
    %c0_40 = arith.constant 0 : index
    %c0_41 = arith.constant 0 : index
    %213 = vector.load %arg5[%212, %c1_39, %c0_40, %c0_41] : memref<1x8x8x128xf32, #tpu.memory_space<vmem>>, vector<1x1x8x128xf32>
    %214 = vector.shape_cast %213 : vector<1x1x8x128xf32> to vector<8x128xf32>
    %215 = vector.shape_cast %210 : vector<8x128xf32> to vector<1x1x8x128xf32>
    tpu.vector_store %arg5[%212, %c1_39, %c0_40, %c0_41], %215 {strides = array<i32>} : memref<1x8x8x128xf32, #tpu.memory_space<vmem>>, vector<1x1x8x128xf32>,
    %216 = arith.index_cast %c0_i32 : i32 to index
    %c5 = arith.constant 5 : index
    %c0_42 = arith.constant 0 : index
    %c0_43 = arith.constant 0 : index
    %217 = vector.load %arg5[%216, %c5, %c0_42, %c0_43] : memref<1x8x8x128xf32, #tpu.memory_space<vmem>>, vector<1x1x8x128xf32>
    %218 = vector.shape_cast %217 : vector<1x1x8x128xf32> to vector<8x128xf32>
    %219 = vector.shape_cast %211 : vector<8x128xf32> to vector<1x1x8x128xf32>
    tpu.vector_store %arg5[%216, %c5, %c0_42, %c0_43], %219 {strides = array<i32>} : memref<1x8x8x128xf32, #tpu.memory_space<vmem>>, vector<1x1x8x128xf32>,
    %cst_44 = arith.constant 0.000000e+00 : f32
    %220 = vector.broadcast %cst_44 : f32 to vector<8x128xf32>
    %221 = arith.subf %220, %81 : vector<8x128xf32>
    %222 = arith.mulf %152, %80 : vector<8x128xf32>
    %223 = arith.mulf %153, %221 : vector<8x128xf32>
    %224 = arith.subf %222, %223 : vector<8x128xf32>
    %225 = arith.mulf %152, %221 : vector<8x128xf32>
    %226 = arith.mulf %153, %80 : vector<8x128xf32>
    %227 = arith.addf %225, %226 : vector<8x128xf32>
    %cst_45 = arith.constant 0.000000e+00 : f32
    %228 = vector.broadcast %cst_45 : f32 to vector<8x128xf32>
    %229 = arith.subf %228, %87 : vector<8x128xf32>
    %230 = arith.mulf %166, %84 : vector<8x128xf32>
    %231 = arith.mulf %167, %229 : vector<8x128xf32>
    %232 = arith.subf %230, %231 : vector<8x128xf32>
    %233 = arith.mulf %166, %229 : vector<8x128xf32>
    %234 = arith.mulf %167, %84 : vector<8x128xf32>
    %235 = arith.addf %233, %234 : vector<8x128xf32>
    %236 = arith.addf %224, %232 : vector<8x128xf32>
    %237 = arith.addf %227, %235 : vector<8x128xf32>
    %238 = arith.index_cast %c0_i32 : i32 to index
    %c2_46 = arith.constant 2 : index
    %c0_47 = arith.constant 0 : index
    %c0_48 = arith.constant 0 : index
    %239 = vector.load %arg5[%238, %c2_46, %c0_47, %c0_48] : memref<1x8x8x128xf32, #tpu.memory_space<vmem>>, vector<1x1x8x128xf32>
    %240 = vector.shape_cast %239 : vector<1x1x8x128xf32> to vector<8x128xf32>
    %241 = vector.shape_cast %236 : vector<8x128xf32> to vector<1x1x8x128xf32>
    tpu.vector_store %arg5[%238, %c2_46, %c0_47, %c0_48], %241 {strides = array<i32>} : memref<1x8x8x128xf32, #tpu.memory_space<vmem>>, vector<1x1x8x128xf32>,
    %242 = arith.index_cast %c0_i32 : i32 to index
    %c6 = arith.constant 6 : index
    %c0_49 = arith.constant 0 : index
    %c0_50 = arith.constant 0 : index
    %243 = vector.load %arg5[%242, %c6, %c0_49, %c0_50] : memref<1x8x8x128xf32, #tpu.memory_space<vmem>>, vector<1x1x8x128xf32>
    %244 = vector.shape_cast %243 : vector<1x1x8x128xf32> to vector<8x128xf32>
    %245 = vector.shape_cast %237 : vector<8x128xf32> to vector<1x1x8x128xf32>
    tpu.vector_store %arg5[%242, %c6, %c0_49, %c0_50], %245 {strides = array<i32>} : memref<1x8x8x128xf32, #tpu.memory_space<vmem>>, vector<1x1x8x128xf32>,
    %cst_51 = arith.constant 0.000000e+00 : f32
    %246 = vector.broadcast %cst_51 : f32 to vector<8x128xf32>
    %247 = arith.subf %246, %91 : vector<8x128xf32>
    %248 = arith.mulf %152, %88 : vector<8x128xf32>
    %249 = arith.mulf %153, %247 : vector<8x128xf32>
    %250 = arith.subf %248, %249 : vector<8x128xf32>
    %251 = arith.mulf %152, %247 : vector<8x128xf32>
    %252 = arith.mulf %153, %88 : vector<8x128xf32>
    %253 = arith.addf %251, %252 : vector<8x128xf32>
    %cst_52 = arith.constant 0.000000e+00 : f32
    %254 = vector.broadcast %cst_52 : f32 to vector<8x128xf32>
    %255 = arith.subf %254, %95 : vector<8x128xf32>
    %256 = arith.mulf %166, %92 : vector<8x128xf32>
    %257 = arith.mulf %167, %255 : vector<8x128xf32>
    %258 = arith.subf %256, %257 : vector<8x128xf32>
    %259 = arith.mulf %166, %255 : vector<8x128xf32>
    %260 = arith.mulf %167, %92 : vector<8x128xf32>
    %261 = arith.addf %259, %260 : vector<8x128xf32>
    %262 = arith.addf %250, %258 : vector<8x128xf32>
    %263 = arith.addf %253, %261 : vector<8x128xf32>
    %264 = arith.index_cast %c0_i32 : i32 to index
    %c3 = arith.constant 3 : index
    %c0_53 = arith.constant 0 : index
    %c0_54 = arith.constant 0 : index
    %265 = vector.load %arg5[%264, %c3, %c0_53, %c0_54] : memref<1x8x8x128xf32, #tpu.memory_space<vmem>>, vector<1x1x8x128xf32>
    %266 = vector.shape_cast %265 : vector<1x1x8x128xf32> to vector<8x128xf32>
    %267 = vector.shape_cast %262 : vector<8x128xf32> to vector<1x1x8x128xf32>
    tpu.vector_store %arg5[%264, %c3, %c0_53, %c0_54], %267 {strides = array<i32>} : memref<1x8x8x128xf32, #tpu.memory_space<vmem>>, vector<1x1x8x128xf32>,
    %268 = arith.index_cast %c0_i32 : i32 to index
    %c7 = arith.constant 7 : index
    %c0_55 = arith.constant 0 : index
    %c0_56 = arith.constant 0 : index
    %269 = vector.load %arg5[%268, %c7, %c0_55, %c0_56] : memref<1x8x8x128xf32, #tpu.memory_space<vmem>>, vector<1x1x8x128xf32>
    %270 = vector.shape_cast %269 : vector<1x1x8x128xf32> to vector<8x128xf32>
    %271 = vector.shape_cast %263 : vector<8x128xf32> to vector<1x1x8x128xf32>
    tpu.vector_store %arg5[%268, %c7, %c0_55, %c0_56], %271 {strides = array<i32>} : memref<1x8x8x128xf32, #tpu.memory_space<vmem>>, vector<1x1x8x128xf32>,
    %c1_i32 = arith.constant 1 : i32
    return
  }
  func.func @transform_0(%arg0: i32) -> (i32, i32) {
    %c0_i32 = arith.constant 0 : i32
    %c0_i32_0 = arith.constant 0 : i32
    %c0_i32_1 = arith.constant 0 : i32
    return %c0_i32, %c0_i32_0 : i32, i32
  }
  func.func @transform_1(%arg0: i32) -> i32 {
    %c0_i32 = arith.constant 0 : i32
    %c0_i32_0 = arith.constant 0 : i32
    return %c0_i32 : i32
  }
  func.func @transform_2(%arg0: i32) -> (i32, i32, i32, i32) {
    %c0_i32 = arith.constant 0 : i32
    %c0_i32_0 = arith.constant 0 : i32
    %c0_i32_1 = arith.constant 0 : i32
    %c0_i32_2 = arith.constant 0 : i32
    return %arg0, %c0_i32, %c0_i32_0, %c0_i32_1 : i32, i32, i32, i32
  }
  func.func @transform_3(%arg0: i32) -> (i32, i32, i32, i32) {
    %c0_i32 = arith.constant 0 : i32
    %c0_i32_0 = arith.constant 0 : i32
    %c0_i32_1 = arith.constant 0 : i32
    %c0_i32_2 = arith.constant 0 : i32
    return %arg0, %c0_i32, %c0_i32_0, %c0_i32_1 : i32, i32, i32, i32
  }
  func.func @transform_4(%arg0: i32) -> (i32, i32, i32, i32) {
    %c0_i32 = arith.constant 0 : i32
    %c0_i32_0 = arith.constant 0 : i32
    %c0_i32_1 = arith.constant 0 : i32
    %c0_i32_2 = arith.constant 0 : i32
    return %arg0, %c0_i32, %c0_i32_0, %c0_i32_1 : i32, i32, i32, i32
  }
}

</mosaic_0001>

<bundles_post_ra>
// kernel: custom-call
= control target key start
LH: loop header
LB: loop body
LE: loop exit
PB: predicated region body
PF: predicated region fallthrough
CT: control target
= control target key end

     0   :  { %2 = vsyncpa [#allocation0], 0  ;;  %s55_s0 = inlined_call_operand.hbm [shape: c64[8,2,2], index: 0, kind: input, shape index: {}]   ;;  %s56_s1 = inlined_call_operand.vmem [shape: f32[8,2,2], index: 1, kind: output, shape index: {}]  }
   0x1   :  { %s4_s8 = sshll.u32 %s55_s0, 4  ;;  %s6_s11 = sshll.u32 %s56_s1, 4  ;;  %s5_s8 = int_to_ptr.hbm [resolvable:$true] %s4_s8  ;;  %s7_s11 = int_to_ptr.vmem [resolvable:$true] %s6_s11 }
   0x2   :  { %9 = dma.hbm_to_vmem [thread:$0]  %s5_s8, 64, %s7_s11, [#allocation0] }
   0x3   :  { %37 = dma.done.wait [#allocation0], 64  }
   0x4   :  { %38 = vsyncadd [#allocation0], 4294967232 }
   0x5   :  { %12 = vsyncpa [#allocation0], 1 }

// kernel: custom-call.1
= control target key start
LH: loop header
LB: loop body
LE: loop exit
PB: predicated region body
PF: predicated region fallthrough
CT: control target
= control target key end

     0   :  { %s56_s0 = inlined_call_operand.hbm [shape: c64[8,2,2], index: 0, kind: input, shape index: {}]   ;;  %s57_s1 = inlined_call_operand.vmem [shape: f32[8,2,2], index: 1, kind: output, shape index: {}]  }
   0x1   :  { %s2_s8 = scalar_lea.hbm %s56_s0, 4 }
   0x2   :  { %3 = vsyncpa [#allocation0], 0  ;;  %s5_s9 = sshll.u32 %s2_s8, 4  ;;  %s7_s12 = sshll.u32 %s57_s1, 4  ;;  %s6_s9 = int_to_ptr.hbm [resolvable:$true] %s5_s9  ;;  %s8_s12 = int_to_ptr.vmem [resolvable:$true] %s7_s12 }
   0x3   :  { %10 = dma.hbm_to_vmem [thread:$0]  %s6_s9, 64, %s8_s12, [#allocation0] }
   0x4   :  { %38 = dma.done.wait [#allocation0], 64  }
   0x5   :  { %39 = vsyncadd [#allocation0], 4294967232 }
   0x6   :  { %13 = vsyncpa [#allocation0], 1 }

// kernel: custom-call.2
= control target key start
LH: loop header
LB: loop body
LE: loop exit
PB: predicated region body
PF: predicated region fallthrough
CT: control target
= control target key end

     0   :  { %s105_s0 = inlined_call_operand.vmem [shape: f32[8,2,2], index: 0, kind: input, shape index: {}]   ;;  %s106_s1 = inlined_call_operand.vmem [shape: f32[8,2,2], index: 1, kind: input, shape index: {}]   ;;  %s107_s2 = inlined_call_operand.hbm [shape: c64[8,2,2], index: 2, kind: output, shape index: {}]  }
   0x1   :  { %s3_s11 = scalar_lea.hbm %s107_s2, 4 }
   0x2   :  { %4 = vsyncpa [#allocation0], 0  ;;  %s6_s14 = sshll.u32 %s105_s0, 4  ;;  %s8_s17 = sshll.u32 %s107_s2, 4  ;;  %s7_s14 = int_to_ptr.vmem [resolvable:$true] %s6_s14  ;;  %s9_s17 = int_to_ptr.hbm [resolvable:$true] %s8_s17 }
   0x3   :  { %11 = dma.vmem_to_hbm [thread:$0]  %s7_s14, 64, %s9_s17, [#allocation0] }
   0x4   :  { %74 = dma.done.wait [#allocation0], 64  }
   0x5   :  { %75 = vsyncadd [#allocation0], 4294967232 }
   0x6   :  { %14 = vsyncpa [#allocation0], 1 }
   0x7   :  { %15 = vsyncpa [#allocation1], 0  ;;  %s17_s20 = sshll.u32 %s106_s1, 4  ;;  %s19_s21 = sshll.u32 %s3_s11, 4  ;;  %s18_s20 = int_to_ptr.vmem [resolvable:$true] %s17_s20  ;;  %s20_s21 = int_to_ptr.hbm [resolvable:$true] %s19_s21 }
   0x8   :  { %22 = dma.vmem_to_hbm [thread:$0]  %s18_s20, 64, %s20_s21, [#allocation1] }
   0x9   :  { %76 = dma.done.wait [#allocation1], 64  }
   0xa   :  { %77 = vsyncadd [#allocation1], 4294967232 }
   0xb   :  { %25 = vsyncpa [#allocation1], 1 }

// kernel: qlayer_forward.1
= control target key start
LH: loop header
LB: loop body
LE: loop exit
PB: predicated region body
PF: predicated region fallthrough
CT: control target
= control target key end

     0   :  { %9 = vsyncpa [#allocation3], 0  ;;  %s1724_s0 = inlined_call_operand.vmem [shape: f32[3,3], index: 0, kind: input, shape index: {}]   ;;  %s1725_s1 = inlined_call_operand.vmem [shape: f32[3], index: 1, kind: input, shape index: {}]   ;;  %s1726_s2 = inlined_call_operand.vmem [shape: f32[1,3,8,128], index: 2, kind: input, shape index: {}]   ;;  %s1727_s3 = inlined_call_operand.vmem [shape: f32[1,8,8,128], index: 3, kind: input, shape index: {}]   ;;  %s1728_s4 = inlined_call_operand.vmem [shape: f32[1,8,8,128], index: 4, kind: output, shape index: {}]  }
   0x1   :  { %s16_s17 = sshll.u32 %s1724_s0, 4  ;;  %s17_s17 = int_to_ptr.vmem [resolvable:$true] %s16_s17 }
   0x2   :  { %10 = vsyncpa [#allocation5], 0  ;;  %s25_s20 = sshll.u32 %s1725_s1, 4  ;;  %s1243_s21 = smov [#allocation2]   ;;  %s26_s20 = int_to_ptr.vmem [resolvable:$true] %s25_s20 }
   0x3   :  { %19 = dma.vmem_to_smem %s17_s17, 64, %s1243_s21, [#allocation3]  }
   0x4   :  { %s1244_s22 = smov [#allocation4]  }
   0x5   :  { %28 = dma.vmem_to_smem %s26_s20, 16, %s1244_s22, [#allocation5]  }
   0x6   :  { %1239 = dma.done.wait [#allocation3], 64  }
   0x7   :  { %1240 = vsyncadd [#allocation3], 4294967232 }
   0x8   :  { %1241 = dma.done.wait [#allocation5], 16  }
   0x9   :  { %1242 = vsyncadd [#allocation5], 4294967280 }
   0xa   :  { %41 = sfence }
   0xb   :  { %s53_s23 = sld [smem:[#allocation4]]  ;;  %v42_v0 = vld [vmem:[%s1726_s2] sm:$0xff]  ;;  %v43_v1 = vld [vmem:[%s1726_s2 + $0x8] sm:$0xff]  ;;  %v44_v2 = vld [vmem:[%s1726_s2 + $0x10] sm:$0xff]  ;;  %v1245_v53 = vmov 683565275  }
   0xc   :  { %s54_s24 = sld [smem:[#allocation2]]  ;;  %v1246_v55 = vmov 2475754826   ;;  %v1247_v57 = vmov 2131351028  }
   0xd   :  { %s1171_s25 = sld [smem:[#allocation2 + $0x1]]  ;;  %v1248_v59 = vmov 2102212464   ;;  %v1249_v61 = vmov 920167782  }
   0xe   :  { %s1172_s0 = sld [smem:[#allocation2 + $0x2]] }
   0xf   :  { %s1173_s26 = sld [smem:[#allocation4 + $0x1]] }
  0x10   :  { %s1174_s1 = sld [smem:[#allocation2 + $0x80]] }
  0x11   :  { %s1175_s5 = sld [smem:[#allocation2 + $0x81]]  ;;  %v57_v4 = vstv %s53_s23 }
  0x12   :  { %v55_v3 = vstv %s54_s24  ;;  %s1176_s8 = sld [smem:[#allocation2 + $0x82]] }
  0x13   :  { %v56_v5 = vmul.f32 %v55_v3, %v42_v0  ;;  %v60_v6 = vstv %s1171_s25  ;;  %s1177_s9 = sld [smem:[#allocation4 + $0x2]] }
  0x14   :  { %v61_v7 = vmul.f32 %v60_v6, %v43_v1  ;;  %v64_v8 = vstv %s1172_s0  ;;  %s1178_s10 = sld [smem:[#allocation2 + $0x100]]  ;;  %v1250_v6 = vmov 1326507024  }
  0x15   :  { %v58_v9 = vadd.f32 %v57_v4, %v56_v5  ;;  %v65_v10 = vmul.f32 %v64_v8, %v44_v2  ;;  %s1179_s11 = sld [smem:[#allocation2 + $0x101]]  ;;  %v71_v12 = vstv %s1173_s26 }
  0x16   :  { %v69_v11 = vstv %s1174_s1  ;;  %s1180_s12 = sld [smem:[#allocation2 + $0x102]] }
  0x17   :  { %v62_v13 = vadd.f32 %v61_v7, %v58_v9  ;;  %v70_v14 = vmul.f32 %v69_v11, %v42_v0  ;;  %v74_v15 = vstv %s1175_s5 }
  0x18   :  { %v75_v16 = vmul.f32 %v74_v15, %v43_v1  ;;  %v78_v17 = vstv %s1176_s8 }
  0x19   :  { %v66_v18 = vadd.f32 %v65_v10, %v62_v13  ;;  %v72_v19 = vadd.f32 %v71_v12, %v70_v14  ;;  %v79_v20 = vmul.f32 %v78_v17, %v44_v2  ;;  %v85_v22 = vstv %s1177_s9 }
  0x1a   :  { %v83_v21 = vstv %s1178_s10 }
  0x1b   :  { %v76_v23 = vadd.f32 %v75_v16, %v72_v19  ;;  %v84_v24 = vmul.f32 %v83_v21, %v42_v0  ;;  %v88_v25 = vstv %s1179_s11  ;;  %v1292_v26 = vmul.f32 0.5, %v66_v18 }
  0x1c   :  { %v89_v27 = vmul.f32 %v88_v25, %v43_v1  ;;  %v92_v28 = vstv %s1180_s12 }
  0x1d   :  { %v86_v29 = vadd.f32 %v85_v22, %v84_v24  ;;  %v93_v30 = vmul.f32 %v92_v28, %v44_v2  ;;  %v100_v31 = vand.u32 2147483647, %v1292_v26  ;;  %v103_v32 = vand.u32 2139095040, %v1292_v26 }
  0x1e   :  { %v80_v33 = vadd.f32 %v79_v20, %v76_v23 }
  0x1f   :  { %v90_v34 = vadd.f32 %v89_v27, %v86_v29  ;;  %v107_v35 = vand.u32 8388607, %v100_v31  ;;  %v104_v36 = vshrl.u32 %v103_v32, 23 }
  0x21   :  { %v94_v37 = vadd.f32 %v93_v30, %v90_v34  ;;  %v1181_v38 = vadd.s32 4294967169, %v104_v36  ;;  %v108_v40 = vor.u32 8388608, %v107_v35 }
  0x23   :  { %v96_v39 = vadd.f32 %v94_v37, %v80_v33  ;;  %v110_v41 = vadd.s32 1, %v1181_v38  ;;  %v98_v43 = vsub.f32 %v80_v33, %v94_v37  ;;  %v1300_v45 = vshll.u32 %v108_v40, 8 }
  0x25   :  { %v1298_v42 = vmul.f32 0.5, %v96_v39  ;;  %vm111_vm0 = vcmp.gt.s32.totalorder %v110_v41, 0  ;;  %v1304_v50 = vmul.f32 0.5, %v98_v43  ;;  %v149_v63 = vand.u32 65535, %v1300_v45 }
  0x26   :  { %v112_v44 = vsel %vm111_vm0, %v110_v41, 0  ;;  %v150_v14 = vshrl.u32 %v1300_v45, 16 }
  0x27   :  { %v409_v46 = vand.u32 2147483647, %v1298_v42  ;;  %v412_v47 = vand.u32 2139095040, %v1298_v42  ;;  %v113_v48 = vshrl.u32 %v112_v44, 5  ;;  %v114_v49 = vand.u32 31, %v112_v44 }
  0x28   :  { %v721_v35 = vand.u32 2139095040, %v1304_v50 }
  0x29   :  { %v413_v51 = vshrl.u32 %v412_v47, 23  ;;  %v115_v52 = vsub.s32 32, %v114_v49  ;;  %v117_v54 = vshll.u32 %v1245_v53, %v114_v49  ;;  %v120_v56 = vshll.u32 %v1246_v55, %v114_v49 }
  0x2a   :  { %v123_v58 = vshll.u32 %v1247_v57, %v114_v49  ;;  %v126_v60 = vshll.u32 %v1248_v59, %v114_v49  ;;  %v129_v62 = vshll.u32 %v1249_v61, %v114_v49  ;;  %v416_v0 = vand.u32 8388607, %v409_v46 }
  0x2b   :  { %v118_v1 = vshrl.u32 %v1246_v55, %v115_v52  ;;  %v121_v2 = vshrl.u32 %v1247_v57, %v115_v52  ;;  %v124_v3 = vshrl.u32 %v1248_v59, %v115_v52  ;;  %vm132_vm1 = vcmp.lt.s32.totalorder %v113_v48, 1 }
  0x2c   :  { %v116_v4 = vshrl.u32 %v1245_v53, %v115_v52  ;;  %v127_v5 = vshrl.u32 %v1249_v61, %v115_v52  ;;  %v130_v7 = vshrl.u32 %v1250_v6, %v115_v52  ;;  %vm135_vm2 = vcmp.lt.s32.totalorder %v113_v48, 4 }
  0x2d   :  { %v119_v8 = vor.u32 %v118_v1, %v117_v54  ;;  %v122_v9 = vor.u32 %v121_v2, %v120_v56  ;;  %v125_v10 = vor.u32 %v124_v3, %v123_v58  ;;  %v1187_v11 = vadd.s32 4294967169, %v413_v51 }
  0x2e   :  { %v128_v12 = vor.u32 %v127_v5, %v126_v60  ;;  %v131_v13 = vor.u32 %v130_v7, %v129_v62  ;;  %vm134_vm3 = vcmp.lt.s32.totalorder %v113_v48, 3  ;;  %vm133_vm4 = vcmp.lt.s32.totalorder %v113_v48, 2 }
  0x2f   :  { %v137_v15 = vsel %vm135_vm2, %v125_v10, 2102212464  ;;  %v140_v16 = vsel %vm132_vm1, %v119_v8, %v122_v9  ;;  %v144_v17 = vsel %vm132_vm1, %v122_v9, %v125_v10  ;;  %v417_v20 = vor.u32 8388608, %v416_v0 }
  0x30   :  { %v141_v18 = vsel %vm135_vm2, %v128_v12, 920167782  ;;  %v145_v19 = vsel %vm135_vm2, %v131_v13, 1326507024  ;;  %v419_v21 = vadd.s32 1, %v1187_v11  ;;  %v136_v22 = vsel %vm132_vm1, %v116_v4, %v119_v8 }
  0x31   :  { %v138_v23 = vsel %vm134_vm3, %v122_v9, %v137_v15  ;;  %v142_v24 = vsel %vm134_vm3, %v125_v10, %v141_v18  ;;  %v146_v25 = vsel %vm134_vm3, %v128_v12, %v145_v19  ;;  %v1330_v39 = vshll.u32 %v417_v20, 8 }
  0x32   :  { %v143_v27 = vsel %vm133_vm4, %v140_v16, %v142_v24  ;;  %v147_v28 = vsel %vm133_vm4, %v144_v17, %v146_v25  ;;  %vm420_vm5 = vcmp.gt.s32.totalorder %v419_v21, 0  ;;  %v1327_v34 = vsel %vm133_vm4, %v136_v22, %v138_v23 }
  0x33   :  { %v151_v29 = vand.u32 65535, %v147_v28  ;;  %v152_v30 = vshrl.u32 %v147_v28, 16  ;;  %v173_v32 = vand.u32 65535, %v143_v27  ;;  %v174_v33 = vshrl.u32 %v143_v27, 16 }
  0x34   :  { %v421_v44 = vsel %vm420_vm5, %v419_v21, 0  ;;  %v1251_v1 = vmov 0  }
  0x35   :  { %v153_v36 = vmul.u32 %v151_v29, %v149_v63  ;;  %v154_v37 = vmul.u32 %v152_v30, %v149_v63  ;;  %v155_v38 = vmul.u32 %v151_v29, %v150_v14  ;;  %v175_v40 = vmul.u32 %v173_v32, %v149_v63 }
  0x36   :  { %v176_v41 = vmul.u32 %v174_v33, %v149_v63  ;;  %v177_v43 = vmul.u32 %v173_v32, %v150_v14  ;;  %v156_v47 = vmul.u32 %v152_v30, %v150_v14  ;;  %v178_v52 = vmul.u32 %v174_v33, %v150_v14 }
  0x37   :  { %v157_v49 = vshll.u32 %v154_v37, 16  ;;  %v159_v51 = vshll.u32 %v155_v38, 16  ;;  %v158_v54 = vshrl.u32 %v154_v37, 16  ;;  %v160_v56 = vshrl.u32 %v155_v38, 16 }
  0x38   :  { %v179_v48 = vshll.u32 %v176_v41, 16  ;;  %v181_v58 = vshll.u32 %v177_v43, 16  ;;  %v180_v62 = vshrl.u32 %v176_v41, 16  ;;  %v423_v0 = vand.u32 31, %v421_v44 }
  0x39   :  { %vm161_vm6 = vc.u32 %v153_v36, %v157_v49  ;;  %v163_v60 = vadd.s32 %v157_v49, %v153_v36  ;;  %v182_v3 = vshrl.u32 %v177_v43, 16  ;;  %v1337_v10 = vshrl.u32 %v421_v44, 5 }
  0x3a   :  { %v162_v2 = vsel %vm161_vm6, 1, %v1251_v1  ;;  %vm183_vm7 = vc.u32 %v175_v40, %v179_v48  ;;  %v185_v63 = vadd.s32 %v179_v48, %v175_v40  ;;  %v1334_v7 = vsub.s32 32, %v423_v0 }
  0x3b   :  { %v164_v4 = vadd.s32 %v162_v2, %v156_v47  ;;  %vm165_vm8 = vc.u32 %v163_v60, %v159_v51  ;;  %v184_v5 = vsel %vm183_vm7, 1, %v1251_v1  ;;  %v426_v14 = vshll.u32 %v1245_v53, %v423_v0 }
  0x3c   :  { %v166_v8 = vsel %vm165_vm8, 1, %v1251_v1  ;;  %v186_v9 = vadd.s32 %v184_v5, %v178_v52  ;;  %vm187_vm9 = vc.u32 %v185_v63, %v181_v58  ;;  %v1340_v13 = vadd.s32 %v185_v63, %v181_v58 }
  0x3d   :  { %v168_v11 = vadd.s32 %v166_v8, %v164_v4  ;;  %v188_v12 = vsel %vm187_vm9, 1, %v1251_v1  ;;  %v427_v16 = vshrl.u32 %v1246_v55, %v1334_v7  ;;  %v429_v17 = vshll.u32 %v1246_v55, %v423_v0 }
  0x3e   :  { %v190_v15 = vadd.s32 %v188_v12, %v186_v9  ;;  %v430_v18 = vshrl.u32 %v1247_v57, %v1334_v7  ;;  %v432_v20 = vshll.u32 %v1247_v57, %v423_v0  ;;  %v433_v21 = vshrl.u32 %v1248_v59, %v1334_v7 }
  0x3f   :  { %v169_v19 = vadd.s32 %v168_v11, %v158_v54  ;;  %v435_v22 = vshll.u32 %v1248_v59, %v423_v0  ;;  %v1352_v24 = vor.u32 %v427_v16, %v426_v14  ;;  %v436_v27 = vshrl.u32 %v1249_v61, %v1334_v7 }
  0x40   :  { %v191_v23 = vadd.s32 %v190_v15, %v180_v62  ;;  %v1354_v25 = vor.u32 %v430_v18, %v429_v17  ;;  %v434_v29 = vor.u32 %v433_v21, %v432_v20  ;;  %v438_v30 = vshll.u32 %v1249_v61, %v423_v0 }
  0x41   :  { %v1358_v28 = vadd.s32 %v169_v19, %v160_v56  ;;  %v439_v32 = vshrl.u32 %v1250_v6, %v1334_v7  ;;  %v437_v36 = vor.u32 %v436_v27, %v435_v22  ;;  %vm441_vm10 = vcmp.lt.s32.totalorder %v1337_v10, 1 }
  0x42   :  { %v192_v33 = vadd.s32 %v191_v23, %v182_v3  ;;  %v722_v37 = vshrl.u32 %v721_v35, 23  ;;  %v193_v38 = vmul.u32 %v1300_v45, %v1327_v34  ;;  %vm443_vm12 = vcmp.lt.s32.totalorder %v1337_v10, 3 }
  0x43   :  { %vm195_vm11 = vc.u32 %v1358_v28, %v1340_v13  ;;  %v440_v40 = vor.u32 %v439_v32, %v438_v30  ;;  %vm442_vm13 = vcmp.lt.s32.totalorder %v1337_v10, 2  ;;  %vm444_vm14 = vcmp.lt.s32.totalorder %v1337_v10, 4 }
  0x44   :  { %v196_v41 = vadd.s32 1, %v192_v33  ;;  %v449_v43 = vsel %vm441_vm10, %v1352_v24, %v1354_v25  ;;  %v450_v35 = vsel %vm444_vm14, %v437_v36, 920167782  ;;  %v453_v45 = vsel %vm441_vm10, %v1354_v25, %v434_v29 }
  0x45   :  { %v454_v34 = vsel %vm444_vm14, %v440_v40, 1326507024  ;;  %v458_v44 = vand.u32 65535, %v1330_v39  ;;  %v451_v49 = vsel %vm443_vm12, %v434_v29, %v450_v35  ;;  %v459_v52 = vshrl.u32 %v1330_v39, 16 }
  0x46   :  { %v197_v47 = vsel %vm195_vm11, %v196_v41, %v192_v33  ;;  %v455_v51 = vsel %vm443_vm12, %v437_v36, %v454_v34  ;;  %v452_v56 = vsel %vm442_vm13, %v449_v43, %v451_v49  ;;  %v1193_v3 = vadd.s32 4294967169, %v722_v37 }
  0x47   :  { %v198_v54 = vadd.s32 %v197_v47, %v193_v38  ;;  %v456_v48 = vsel %vm442_vm13, %v453_v45, %v455_v51  ;;  %v482_v62 = vand.u32 65535, %v452_v56  ;;  %v483_v0 = vshrl.u32 %v452_v56, 16 }
  0x48   :  { %v460_v58 = vand.u32 65535, %v456_v48  ;;  %v461_v60 = vshrl.u32 %v456_v48, 16  ;;  %v728_v17 = vadd.s32 1, %v1193_v3  ;;  %v425_v22 = vshrl.u32 %v1245_v53, %v1334_v7 }
  0x49   :  { %v199_v2 = vadd.s32 536870912, %v198_v54  ;;  %v485_v9 = vmul.u32 %v483_v0, %v458_v44  ;;  %v486_v15 = vmul.u32 %v482_v62, %v459_v52  ;;  %v484_v19 = vmul.u32 %v482_v62, %v458_v44 }
  0x4a   :  { %v462_v63 = vmul.u32 %v460_v58, %v458_v44  ;;  %v463_v4 = vmul.u32 %v461_v60, %v458_v44  ;;  %v464_v5 = vmul.u32 %v460_v58, %v459_v52  ;;  %v465_v11 = vmul.u32 %v461_v60, %v459_v52 }
  0x4b   :  { %v1392_v8 = vshrl.u32 %v199_v2, 30  ;;  %v488_v20 = vshll.u32 %v485_v9, 16  ;;  %v487_v32 = vmul.u32 %v483_v0, %v459_v52  ;;  %v490_v33 = vshll.u32 %v486_v15, 16 }
  0x4c   :  { %v466_v12 = vshll.u32 %v463_v4, 16  ;;  %v468_v14 = vshll.u32 %v464_v5, 16  ;;  %v467_v23 = vshrl.u32 %v463_v4, 16  ;;  %v446_v37 = vsel %vm444_vm14, %v434_v29, 2102212464 }
  0x4d   :  { %v201_v16 = vshll.u32 %v1392_v8, 30  ;;  %vm492_vm2 = vc.u32 %v484_v19, %v488_v20  ;;  %v494_v41 = vadd.s32 %v488_v20, %v484_v19  ;;  %vm729_vm3 = vcmp.gt.s32.totalorder %v728_v17, 0 }
  0x4e   :  { %vm470_vm15 = vc.u32 %v462_v63, %v466_v12  ;;  %v472_v18 = vadd.s32 %v466_v12, %v462_v63  ;;  %v469_v43 = vshrl.u32 %v464_v5, 16  ;;  %v493_v35 = vsel %vm492_vm2, 1, %v1251_v1 }
  0x4f   :  { %v1395_v21 = vsub.s32 %v198_v54, %v201_v16  ;;  %v471_v27 = vsel %vm470_vm15, 1, %v1251_v1  ;;  %v730_v45 = vsel %vm729_vm3, %v728_v17, 0  ;;  %v489_v44 = vshrl.u32 %v485_v9, 16 }
  0x50   :  { %v473_v30 = vadd.s32 %v471_v27, %v465_v11  ;;  %vm474_vm0 = vc.u32 %v472_v18, %v468_v14  ;;  %v495_v47 = vadd.s32 %v493_v35, %v487_v32  ;;  %vm496_vm4 = vc.u32 %v494_v41, %v490_v33 }
  0x51   :  { %vm203_vm1 = vcmp.lt.s32.totalorder %v1395_v21, 0  ;;  %v204_v36 = vsub.s32 0, %v1395_v21  ;;  %v475_v38 = vsel %vm474_vm0, 1, %v1251_v1  ;;  %v497_v49 = vsel %vm496_vm4, 1, %v1251_v1 }
  0x52   :  { %v477_v40 = vadd.s32 %v475_v38, %v473_v30  ;;  %v499_v29 = vadd.s32 %v497_v49, %v495_v47  ;;  %v732_v52 = vand.u32 31, %v730_v45  ;;  %v445_v54 = vsel %vm441_vm10, %v425_v22, %v1352_v24 }
  0x53   :  { %v205_v7 = vsel %vm203_vm1, %v204_v36, %v1395_v21  ;;  %v447_v56 = vsel %vm443_vm12, %v1354_v25, %v446_v37  ;;  %v491_v48 = vshrl.u32 %v486_v15, 16  ;;  %v1416_v60 = vadd.s32 %v494_v41, %v490_v33 }
  0x54   :  { %v478_v34 = vadd.s32 %v477_v40, %v467_v23  ;;  %v206_v51 = vclz %v205_v7  ;;  %v500_v62 = vadd.s32 %v499_v29, %v489_v44  ;;  %v718_v0 = vand.u32 2147483647, %v1304_v50 }
  0x55   :  { %v448_v3 = vsel %vm442_vm13, %v445_v54, %v447_v56  ;;  %v1421_v63 = vsub.s32 32, %v732_v52  ;;  %v738_v9 = vshll.u32 %v1246_v55, %v732_v52  ;;  %v741_v11 = vshll.u32 %v1247_v57, %v732_v52 }
  0x56   :  { %v1414_v58 = vadd.s32 %v478_v34, %v469_v43  ;;  %v1182_v2 = vadd.s32 4294967294, %v206_v51  ;;  %v501_v4 = vadd.s32 %v500_v62, %v491_v48  ;;  %v725_v24 = vand.u32 8388607, %v718_v0 }
  0x57   :  { %v502_v25 = vmul.u32 %v1330_v39, %v448_v3  ;;  %v739_v10 = vshrl.u32 %v1247_v57, %v1421_v63  ;;  %v742_v12 = vshrl.u32 %v1248_v59, %v1421_v63  ;;  %v744_v14 = vshll.u32 %v1248_v59, %v732_v52 }
  0x58   :  { %vm504_vm5 = vc.u32 %v1414_v58, %v1416_v60  ;;  %v505_v5 = vadd.s32 1, %v501_v4  ;;  %vm1183_vm6 = vcmp.lt.s32.totalorder %v1182_v2, 0  ;;  %v1435_v16 = vshrl.u32 %v730_v45, 5 }
  0x59   :  { %v745_v39 = vshrl.u32 %v1249_v61, %v1421_v63  ;;  %v747_v17 = vshll.u32 %v1249_v61, %v732_v52  ;;  %v726_v18 = vor.u32 8388608, %v725_v24  ;;  %v735_v19 = vshll.u32 %v1245_v53, %v732_v52 }
  0x5a   :  { %v506_v15 = vsel %vm504_vm5, %v505_v5, %v501_v4  ;;  %v209_v20 = vsel %vm1183_vm6, 0, %v1182_v2  ;;  %v736_v57 = vshrl.u32 %v1246_v55, %v1421_v63  ;;  %v748_v23 = vshrl.u32 %v1250_v6, %v1421_v63 }
  0x5b   :  { %v507_v22 = vadd.s32 %v506_v15, %v502_v25  ;;  %v1445_v59 = vor.u32 %v739_v10, %v738_v9  ;;  %v1447_v27 = vor.u32 %v742_v12, %v741_v11  ;;  %v746_v30 = vor.u32 %v745_v39, %v744_v14 }
  0x5c   :  { %v749_v33 = vor.u32 %v748_v23, %v747_v17  ;;  %vm750_vm7 = vcmp.lt.s32.totalorder %v1435_v16, 1  ;;  %v214_v61 = vsub.s32 4294967266, %v209_v20  ;;  %vm753_vm8 = vcmp.lt.s32.totalorder %v1435_v16, 4 }
  0x5d   :  { %v508_v32 = vadd.s32 536870912, %v507_v22  ;;  %v1451_v36 = vshll.u32 %v726_v18, 8  ;;  %v1455_v55 = vor.u32 %v736_v57, %v735_v19  ;;  %vm752_vm9 = vcmp.lt.s32.totalorder %v1435_v16, 3 }
  0x5e   :  { %vm751_vm10 = vcmp.lt.s32.totalorder %v1435_v16, 2  ;;  %v759_v6 = vsel %vm753_vm8, %v746_v30, 920167782  ;;  %v762_v38 = vsel %vm750_vm7, %v1445_v59, %v1447_v27  ;;  %v763_v40 = vsel %vm753_vm8, %v749_v33, 1326507024 }
  0x5f   :  { %v1453_v37 = vshrl.u32 %v508_v32, 30  ;;  %v194_v41 = vadd.s32 %v1340_v13, %v1358_v28  ;;  %v210_v43 = vsub.s32 32, %v209_v20  ;;  %v215_v35 = vadd.s32 127, %v214_v61 }
  0x60   :  { %v764_v45 = vsel %vm752_vm9, %v746_v30, %v763_v40  ;;  %v767_v34 = vand.u32 65535, %v1451_v36  ;;  %v758_v47 = vsel %vm750_vm7, %v1455_v55, %v1445_v59  ;;  %v760_v49 = vsel %vm752_vm9, %v1447_v27, %v759_v6 }
  0x61   :  { %v510_v7 = vshll.u32 %v1453_v37, 30  ;;  %v765_v13 = vsel %vm751_vm10, %v762_v38, %v764_v45  ;;  %v768_v52 = vshrl.u32 %v1451_v36, 16  ;;  %v211_v54 = vshll.u32 %v1395_v21, %v209_v20 }
  0x62   :  { %v769_v28 = vand.u32 65535, %v765_v13  ;;  %v770_v51 = vshrl.u32 %v765_v13, 16  ;;  %v761_v56 = vsel %vm751_vm10, %v758_v47, %v760_v49  ;;  %v212_v62 = vshrl.u32 %v194_v41, %v210_v43 }
  0x63   :  { %v511_v44 = vsub.s32 %v507_v22, %v510_v7  ;;  %v216_v2 = vshll.u32 %v215_v35, 23  ;;  %v792_v9 = vshrl.u32 %v761_v56, 16  ;;  %v503_v14 = vadd.s32 %v1416_v60, %v1414_v58 }
  0x64   :  { %v772_v48 = vmul.u32 %v770_v51, %v767_v34  ;;  %v771_v4 = vmul.u32 %v769_v28, %v767_v34  ;;  %v773_v5 = vmul.u32 %v769_v28, %v768_v52  ;;  %v213_v10 = vor.u32 %v212_v62, %v211_v54 }
  0x65   :  { %vm512_vm11 = vcmp.lt.s32.totalorder %v511_v44, 0  ;;  %v513_v29 = vsub.s32 0, %v511_v44  ;;  %v217_v12 = vor.u32 4788187, %v216_v2  ;;  %v791_v21 = vand.u32 65535, %v761_v56 }
  0x66   :  { %v775_v25 = vshll.u32 %v772_v48, 16  ;;  %v774_v39 = vmul.u32 %v770_v51, %v768_v52  ;;  %v777_v17 = vshll.u32 %v773_v5, 16  ;;  %v794_v18 = vmul.u32 %v792_v9, %v767_v34 }
  0x67   :  { %v514_v3 = vsel %vm512_vm11, %v513_v29, %v511_v44  ;;  %v218_v23 = vand.u32 2147483647, %v217_v12  ;;  %v220_v30 = vcvt.s32.f32 %v213_v10  ;;  %v795_v61 = vmul.u32 %v791_v21, %v768_v52 }
  0x68   :  { %v515_v24 = vclz %v514_v3  ;;  %vm779_vm12 = vc.u32 %v771_v4, %v775_v25  ;;  %v781_v57 = vadd.s32 %v775_v25, %v771_v4  ;;  %v793_v40 = vmul.u32 %v791_v21, %v767_v34 }
  0x69   :  { %v780_v22 = vsel %vm779_vm12, 1, %v1251_v1  ;;  %v797_v58 = vshll.u32 %v794_v18, 16  ;;  %v221_v41 = vmul.f32 %v220_v30, %v218_v23  ;;  %v776_v43 = vshrl.u32 %v772_v48, 16 }
  0x6a   :  { %v1188_v11 = vadd.s32 4294967294, %v515_v24  ;;  %v782_v38 = vadd.s32 %v780_v22, %v774_v39  ;;  %vm783_vm14 = vc.u32 %v781_v57, %v777_v17  ;;  %v796_v47 = vmul.u32 %v792_v9, %v768_v52 }
  0x6b   :  { %v784_v35 = vsel %vm783_vm14, 1, %v1251_v1  ;;  %v799_v49 = vshll.u32 %v795_v61, 16  ;;  %vm801_vm15 = vc.u32 %v793_v40, %v797_v58  ;;  %v803_v51 = vadd.s32 %v797_v58, %v793_v40 }
  0x6c   :  { %vm1189_vm13 = vcmp.lt.s32.totalorder %v1188_v11, 0  ;;  %v786_v28 = vadd.s32 %v784_v35, %v782_v38  ;;  %vm102_vm0 = vcmp.lt.s32.totalorder %v1292_v26, 0  ;;  %v755_v34 = vsel %vm753_vm8, %v1447_v27, 2102212464 }
  0x6d   :  { %v518_v15 = vsel %vm1189_vm13, 0, %v1188_v11  ;;  %v802_v29 = vsel %vm801_vm15, 1, %v1251_v1  ;;  %v222_v54 = vxor.u32 2147483648, %v221_v41  ;;  %v778_v48 = vshrl.u32 %v773_v5, 16 }
  0x6e   :  { %v519_v19 = vsub.s32 32, %v518_v15  ;;  %v520_v20 = vshll.u32 %v511_v44, %v518_v15  ;;  %v523_v32 = vsub.s32 4294967266, %v518_v15  ;;  %v734_v44 = vshrl.u32 %v1245_v53, %v1421_v63 }
  0x6f   :  { %v787_v62 = vadd.s32 %v786_v28, %v776_v43  ;;  %vm1499_vm1 = vcmp.le.f32.partialorder %v100_v31, 0.7853982  ;;  %v798_v63 = vshrl.u32 %v794_v18, 16  ;;  %v804_v52 = vadd.s32 %v802_v29, %v796_v47 }
  0x70   :  { %v521_v33 = vshrl.u32 %v503_v14, %v519_v19  ;;  %v524_v6 = vadd.s32 127, %v523_v32  ;;  %vm805_vm2 = vc.u32 %v803_v51, %v799_v49  ;;  %v754_v27 = vsel %vm750_vm7, %v734_v44, %v1455_v55 }
  0x71   :  { %v756_v3 = vsel %vm752_vm9, %v1445_v59, %v755_v34  ;;  %v806_v4 = vsel %vm805_vm2, 1, %v1251_v1  ;;  %vm1512_vm3 = vcmp.le.f32.partialorder %v409_v46, 0.7853982  ;;  %vm411_vm4 = vcmp.lt.s32.totalorder %v1298_v42, 0 }
  0x72   :  { %v522_v60 = vor.u32 %v521_v33, %v520_v20  ;;  %v525_v7 = vshll.u32 %v524_v6, 23  ;;  %v800_v24 = vshrl.u32 %v795_v61, 16  ;;  %v808_v25 = vadd.s32 %v806_v4, %v804_v52 }
  0x73   :  { %v223_v5 = vsel %vm102_vm0, %v222_v54, %v221_v41  ;;  %v788_v9 = vadd.s32 %v787_v62, %v778_v48  ;;  %v807_v11 = vadd.s32 %v803_v51, %v799_v49  ;;  %v757_v59 = vsel %vm751_vm10, %v754_v27, %v756_v3 }
  0x74   :  { %v529_v45 = vcvt.s32.f32 %v522_v60  ;;  %v526_v13 = vor.u32 4788187, %v525_v7  ;;  %v809_v1 = vadd.s32 %v808_v25, %v798_v63  ;;  %v1526_v10 = vsel %vm1499_vm1, %v1292_v26, %v223_v5 }
  0x75   :  { %v811_v21 = vmul.u32 %v1451_v36, %v757_v59  ;;  %vm813_vm5 = vc.u32 %v788_v9, %v807_v11  ;;  %v228_v39 = vmul.f32 %v1526_v10, %v1526_v10  ;;  %v533_v41 = vsub.s32 4, %v1453_v37 }
  0x76   :  { %v527_v56 = vand.u32 2147483647, %v526_v13  ;;  %v810_v14 = vadd.s32 %v809_v1, %v800_v24  ;;  %v224_v13 = vsub.s32 4, %v1392_v8  ;;  %v812_v29 = vadd.s32 %v807_v11, %v788_v9 }
  0x77   :  { %v236_v20 = vmul.f32 -0.00019511016, %v228_v39  ;;  %v229_v32 = vmul.f32 -0.001358992, %v228_v39  ;;  %v534_v28 = vsel %vm411_vm4, %v533_v41, %v1453_v37  ;;  %vm720_vm9 = vcmp.lt.s32.totalorder %v1304_v50, 0 }
  0x78   :  { %v530_v2 = vmul.f32 %v529_v45, %v527_v56  ;;  %v814_v16 = vadd.s32 1, %v810_v14  ;;  %v536_v62 = vsel %vm1512_vm3, 0, %v534_v28  ;;  %v225_v27 = vsel %vm102_vm0, %v224_v13, %v1392_v8 }
  0x79   :  { %v237_v33 = vadd.f32 0.008332121, %v236_v20  ;;  %v230_v40 = vadd.f32 0.041655596, %v229_v32  ;;  %v227_v9 = vsel %vm1499_vm1, 0, %v225_v27 }
  0x7a   :  { %v531_v55 = vxor.u32 2147483648, %v530_v2  ;;  %v815_v17 = vsel %vm813_vm5, %v814_v16, %v810_v14  ;;  %v244_v59 = vand.u32 3, %v227_v9  ;;  %v553_v14 = vand.u32 3, %v536_v62 }
  0x7b   :  { %v816_v18 = vadd.s32 %v815_v17, %v811_v21  ;;  %v238_v58 = vmul.f32 %v237_v33, %v228_v39  ;;  %v231_v44 = vmul.f32 %v230_v40, %v228_v39  ;;  %vm1554_vm15 = vcmp.le.f32.partialorder %v718_v0, 0.7853982 }
  0x7c   :  { %v532_v46 = vsel %vm411_vm4, %v531_v55, %v530_v2  ;;  %v707_v55 = vadd.s32 3, %v536_v62  ;;  %vm246_vm8 = vcmp.eq.s32.totalorder %v244_v59, 0  ;;  %vm555_vm10 = vcmp.eq.s32.totalorder %v553_v14, 0 }
  0x7d   :  { %v535_v12 = vsel %vm1512_vm3, %v1298_v42, %v532_v46  ;;  %v817_v22 = vadd.s32 536870912, %v816_v18  ;;  %v239_v47 = vadd.f32 -0.16666654, %v238_v58  ;;  %v232_v54 = vadd.f32 -0.4999988, %v231_v44 }
  0x7e   :  { %v537_v15 = vmul.f32 %v535_v12, %v535_v12  ;;  %vm558_vm11 = vcmp.eq.s32.totalorder %v553_v14, 2  ;;  %vm249_vm14 = vcmp.eq.s32.totalorder %v244_v59, 2  ;;  %vm554_vm0 = vcmp.lt.s32.totalorder %v553_v14, 2 }
  0x7f   :  { %v1534_v23 = vshrl.u32 %v817_v22, 30  ;;  %v240_v56 = vmul.f32 %v239_v47, %v228_v39  ;;  %v233_v25 = vmul.f32 %v232_v54, %v228_v39  ;;  %vm245_vm2 = vcmp.lt.s32.totalorder %v244_v59, 2  ;;  %v47_v59 = vld [vmem:[%s1727_s3 + $0x10] sm:$0xff] }
  0x80   :  { %v545_v19 = vmul.f32 -0.00019511016, %v537_v15  ;;  %v538_v57 = vmul.f32 -0.001358992, %v537_v15  ;;  %vm552_vm5 = vweird.f32 %v1298_v42 }
  0x81   :  { %v819_v61 = vshll.u32 %v1534_v23, 30  ;;  %v241_v5 = vadd.f32 1.0, %v240_v56  ;;  %v234_v17 = vadd.f32 1.0, %v233_v25  ;;  %v842_v53 = vsub.s32 4, %v1534_v23 }
  0x82   :  { %v546_v30 = vadd.f32 0.008332121, %v545_v19  ;;  %v539_v36 = vadd.f32 0.041655596, %v538_v57 }
  0x83   :  { %v820_v6 = vsub.s32 %v816_v18, %v819_v61  ;;  %v242_v8 = vmul.f32 %v241_v5, %v1526_v10  ;;  %v398_v18 = vadd.s32 3, %v227_v9  ;;  %v250_v57 = vxor.u32 2147483648, %v234_v17  ;;  %v1596_v9 = vld [vmem:[%s1727_s3 + $0x8] sm:$0xff] }
  0x84   :  { %v547_v38 = vmul.f32 %v546_v30, %v537_v15  ;;  %v540_v7 = vmul.f32 %v539_v36, %v537_v15  ;;  %v843_v61 = vsel %vm720_vm9, %v842_v53, %v1534_v23 }
  0x85   :  { %vm821_vm6 = vcmp.lt.s32.totalorder %v820_v6, 0  ;;  %v822_v60 = vsub.s32 0, %v820_v6  ;;  %v399_v30 = vand.u32 3, %v398_v18  ;;  %v251_v58 = vsel %vm249_vm14, %v250_v57, %v242_v8  ;;  %v52_v18 = vld [vmem:[%s1727_s3 + $0x38] sm:$0xff] }
  0x86   :  { %v548_v35 = vadd.f32 -0.16666654, %v547_v38  ;;  %v541_v51 = vadd.f32 -0.4999988, %v540_v7  ;;  %v845_v23 = vsel %vm1554_vm15, 0, %v843_v61 }
  0x87   :  { %v823_v43 = vsel %vm821_vm6, %v822_v60, %v820_v6  ;;  %vm401_vm3 = vcmp.eq.s32.totalorder %v399_v30, 0  ;;  %vm404_vm4 = vcmp.eq.s32.totalorder %v399_v30, 2  ;;  %vm243_vm6 = vweird.f32 %v1292_v26 }
  0x88   :  { %v824_v45 = vclz %v823_v43  ;;  %v549_v34 = vmul.f32 %v548_v35, %v537_v15  ;;  %v542_v3 = vmul.f32 %v541_v51, %v537_v15  ;;  %v708_v15 = vand.u32 3, %v707_v55 }
  0x89   :  { %v1016_v13 = vadd.s32 3, %v845_v23  ;;  %v862_v62 = vand.u32 3, %v845_v23 }
  0x8a   :  { %v1194_v49 = vadd.s32 4294967294, %v824_v45  ;;  %v550_v4 = vadd.f32 1.0, %v549_v34  ;;  %v543_v1 = vadd.f32 1.0, %v542_v3  ;;  %vm710_vm12 = vcmp.eq.s32.totalorder %v708_v15, 0  ;;  %v1588_v3 = vld [vmem:[%s1727_s3 + $0x20] sm:$0xff] }
  0x8b   :  { %vm713_vm13 = vcmp.eq.s32.totalorder %v708_v15, 2  ;;  %vm709_vm1 = vcmp.lt.s32.totalorder %v708_v15, 2  ;;  %v48_v15 = vld [vmem:[%s1727_s3 + $0x18] sm:$0xff] }
  0x8c   :  { %vm1195_vm7 = vcmp.lt.s32.totalorder %v1194_v49, 0  ;;  %v551_v46 = vmul.f32 %v550_v4, %v535_v12  ;;  %v559_v39 = vxor.u32 2147483648, %v543_v1  ;;  %v247_v12 = vxor.u32 2147483648, %v242_v8 }
  0x8d   :  { %v827_v48 = vsel %vm1195_vm7, 0, %v1194_v49  ;;  %vm400_vm7 = vcmp.lt.s32.totalorder %v399_v30, 2  ;;  %v406_v49 = vsel %vm404_vm4, %v250_v57, %v242_v8 }
  0x8e   :  { %v828_v63 = vsub.s32 32, %v827_v48  ;;  %v829_v52 = vshll.u32 %v820_v6, %v827_v48  ;;  %v832_v2 = vsub.s32 4294967266, %v827_v48  ;;  %v556_v20 = vxor.u32 2147483648, %v551_v46 }
  0x8f   :  { %v560_v33 = vsel %vm558_vm11, %v559_v39, %v551_v46  ;;  %v715_v38 = vsel %vm713_vm13, %v559_v39, %v551_v46  ;;  %v248_v0 = vsel %vm246_vm8, %v234_v17, %v247_v12  ;;  %v403_v47 = vsel %vm401_vm3, %v234_v17, %v247_v12 }
  0x90   :  { %v830_v37 = vshrl.u32 %v812_v29, %v828_v63  ;;  %v833_v24 = vadd.s32 127, %v832_v2  ;;  %v557_v36 = vsel %vm555_vm10, %v543_v1, %v556_v20  ;;  %v712_v6 = vsel %vm710_vm12, %v543_v1, %v556_v20  ;;  %v1579_v63 = vld [vmem:[%s1727_s3] sm:$0xff] }
  0x91   :  { %v561_v7 = vsel %vm554_vm0, %v557_v36, %v560_v33  ;;  %v716_v43 = vsel %vm709_vm1, %v712_v6, %v715_v38  ;;  %v252_v35 = vsel %vm245_vm2, %v248_v0, %v251_v58  ;;  %v407_v54 = vsel %vm400_vm7, %v403_v47, %v406_v49 }
  0x92   :  { %v831_v11 = vor.u32 %v830_v37, %v829_v52  ;;  %v834_v31 = vshll.u32 %v833_v24, 23  ;;  %v562_v28 = vsel %vm552_vm5, nan, %v561_v7  ;;  %v717_v51 = vsel %vm552_vm5, nan, %v716_v43 }
  0x93   :  { %v253_v42 = vsel %vm243_vm6, nan, %v252_v35  ;;  %v1017_v52 = vand.u32 3, %v1016_v13  ;;  %v408_v25 = vsel %vm243_vm6, nan, %v407_v54  ;;  %vm861_vm8 = vweird.f32 %v1304_v50 }
  0x94   :  { %v835_v21 = vor.u32 4788187, %v834_v31  ;;  %v838_v16 = vcvt.s32.f32 %v831_v11  ;;  %v1581_v2 = vmul.f32 %v562_v28, %v253_v42  ;;  %v1583_v27 = vmul.f32 %v717_v51, %v253_v42  ;;  %v1601_v11 = vld [vmem:[%s1727_s3 + $0x28] sm:$0xff] }
  0x95   :  { %v1033_v24 = vsub.f32 0.0, %v253_v42  ;;  %vm864_vm10 = vcmp.eq.s32.totalorder %v862_v62, 0  ;;  %vm867_vm11 = vcmp.eq.s32.totalorder %v862_v62, 2  ;;  %vm1019_vm12 = vcmp.eq.s32.totalorder %v1017_v52, 0 }
  0x96   :  { %v836_v19 = vand.u32 2147483647, %v835_v21  ;;  %v1605_v26 = vmul.f32 %v1581_v2, %v1579_v63  ;;  %v1609_v31 = vmul.f32 %v1583_v27, %v1588_v3  ;;  %vm1022_vm13 = vcmp.eq.s32.totalorder %v1017_v52, 2  ;;  %v51_v21 = vld [vmem:[%s1727_s3 + $0x30] sm:$0xff] }
  0x97   :  { %v1034_v14 = vmul.f32 %v1033_v24, %v717_v51  ;;  %vm1018_vm14 = vcmp.lt.s32.totalorder %v1017_v52, 2  ;;  %v1038_v17 = vmul.f32 %v1581_v2, %v1588_v3  ;;  %v1039_v8 = vmul.f32 %v1583_v27, %v1579_v63 }
  0x98   :  { %v839_v22 = vmul.f32 %v838_v16, %v836_v19  ;;  %v1029_v16 = vsub.f32 0.0, %v408_v25  ;;  %v1049_v53 = vmul.f32 %v1581_v2, %v1596_v9  ;;  %v1050_v20 = vmul.f32 %v1583_v27, %v1601_v11 }
  0x99   :  { %v1052_v12 = vmul.f32 %v1581_v2, %v1601_v11  ;;  %v1053_v57 = vmul.f32 %v1583_v27, %v1596_v9  ;;  %v1069_v30 = vmul.f32 %v1581_v2, %v47_v59  ;;  %v1070_v61 = vmul.f32 %v1034_v14, %v51_v21 }
  0x9a   :  { %v840_v32 = vxor.u32 2147483648, %v839_v22  ;;  %v1072_v36 = vmul.f32 %v1581_v2, %v51_v21  ;;  %v1073_v6 = vmul.f32 %v1034_v14, %v47_v59  ;;  %v1083_v38 = vmul.f32 %v1581_v2, %v48_v15 }
  0x9b   :  { %v1087_v23 = vmul.f32 %v1034_v14, %v48_v15  ;;  %v1040_v43 = vadd.f32 %v1039_v8, %v1038_v17  ;;  %v1051_v35 = vsub.f32 %v1049_v53, %v1050_v20  ;;  %v1054_v47 = vadd.f32 %v1053_v57, %v1052_v12 }
  0x9c   :  { %v841_v40 = vsel %vm720_vm9, %v840_v32, %v839_v22  ;;  %vm863_vm9 = vcmp.lt.s32.totalorder %v862_v62, 2  ;;  %v1037_v22 = vsub.f32 %v1605_v26, %v1609_v31  ;;  %v1071_v49 = vsub.f32 %v1069_v30, %v1070_v61 }
  0x9d   :  { %v844_v60 = vsel %vm1554_vm15, %v1304_v50, %v841_v40  ;;  %v1084_v40 = vmul.f32 %v1034_v14, %v52_v18  ;;  %v1656_v54 = vsub.f32 0.0, %v1583_v27 }
  0x9e   :  { %v846_v41 = vmul.f32 %v844_v60, %v844_v60 }
  0xa0   :  { %v847_v45 = vmul.f32 -0.001358992, %v846_v41  ;;  %v854_v44 = vmul.f32 -0.00019511016, %v846_v41 }
  0xa2   :  { %v848_v34 = vadd.f32 0.041655596, %v847_v45  ;;  %v855_v29 = vadd.f32 0.008332121, %v854_v44 }
  0xa4   :  { %v849_v56 = vmul.f32 %v848_v34, %v846_v41  ;;  %v856_v48 = vmul.f32 %v855_v29, %v846_v41  ;;  %v1074_v34 = vadd.f32 %v1073_v6, %v1072_v36  ;;  %v1085_v29 = vsub.f32 %v1083_v38, %v1084_v40 }
  0xa6   :  { %v850_v4 = vadd.f32 -0.4999988, %v849_v56  ;;  %v857_v37 = vadd.f32 -0.16666654, %v856_v48  ;;  %v1658_v56 = vsub.f32 0.0, %v1034_v14 }
  0xa8   :  { %v851_v5 = vmul.f32 %v850_v4, %v846_v41  ;;  %v858_v55 = vmul.f32 %v857_v37, %v846_v41 }
  0xaa   :  { %v852_v1 = vadd.f32 1.0, %v851_v5  ;;  %v859_v46 = vadd.f32 1.0, %v858_v55 }
  0xac   :  { %v860_v19 = vmul.f32 %v859_v46, %v844_v60  ;;  %v868_v39 = vxor.u32 2147483648, %v852_v1  ;;  %v1086_v60 = vmul.f32 %v1581_v2, %v52_v18 }
  0xae   :  { %v865_v10 = vxor.u32 2147483648, %v860_v19  ;;  %v869_v32 = vsel %vm867_vm11, %v868_v39, %v860_v19  ;;  %v1024_v33 = vsel %vm1022_vm13, %v868_v39, %v860_v19  ;;  %v1088_v42 = vadd.f32 %v1087_v23, %v1086_v60 }
  0xb0   :  { %v866_v0 = vsel %vm864_vm10, %v852_v1, %v865_v10  ;;  %v1021_v58 = vsel %vm1019_vm12, %v852_v1, %v865_v10 }
  0xb1   :  { %v870_v41 = vsel %vm863_vm9, %v866_v0, %v869_v32  ;;  %v1025_v7 = vsel %vm1018_vm14, %v1021_v58, %v1024_v33 }
  0xb2   :  { %v871_v45 = vsel %vm861_vm8, nan, %v870_v41  ;;  %v1026_v44 = vsel %vm861_vm8, nan, %v1025_v7 }
  0xb3   :  { %v1651_v13 = vmul.f32 %v1029_v16, %v871_v45  ;;  %v1031_v28 = vmul.f32 %v1029_v16, %v1026_v44  ;;  %v1653_v51 = vmul.f32 %v871_v45, %v408_v25 }
  0xb5   :  { %v1041_v48 = vmul.f32 %v1651_v13, %v47_v59  ;;  %v1042_v62 = vmul.f32 %v1031_v28, %v51_v21  ;;  %v1044_v50 = vmul.f32 %v1651_v13, %v51_v21  ;;  %v1045_v52 = vmul.f32 %v1031_v28, %v47_v59 }
  0xb6   :  { %v1055_v4 = vmul.f32 %v1651_v13, %v48_v15  ;;  %v1056_v37 = vmul.f32 %v1031_v28, %v52_v18  ;;  %v1058_v24 = vmul.f32 %v1651_v13, %v52_v18  ;;  %v1059_v25 = vmul.f32 %v1031_v28, %v48_v15 }
  0xb7   :  { %v1043_v5 = vsub.f32 %v1041_v48, %v1042_v62  ;;  %v1046_v55 = vadd.f32 %v1045_v52, %v1044_v50  ;;  %v1063_v27 = vmul.f32 %v1653_v51, %v1579_v63  ;;  %v1064_v26 = vmul.f32 %v1031_v28, %v1588_v3 }
  0xb8   :  { %v1057_v31 = vsub.f32 %v1055_v4, %v1056_v37  ;;  %v1060_v1 = vadd.f32 %v1059_v25, %v1058_v24  ;;  %v1066_v46 = vmul.f32 %v1653_v51, %v1588_v3  ;;  %v1067_v59 = vmul.f32 %v1031_v28, %v1579_v63 }
  0xb9   :  { %v1047_v14 = vadd.f32 %v1043_v5, %v1037_v22  ;;  %v1048_v21 = vadd.f32 %v1046_v55, %v1040_v43  ;;  %v1065_v16 = vsub.f32 %v1063_v27, %v1064_v26  ;;  %v1077_v17 = vmul.f32 %v1653_v51, %v1596_v9 }
  0xba   :  { %v1061_v8 = vadd.f32 %v1057_v31, %v1051_v35  ;;  %v1062_v15 = vadd.f32 %v1060_v1, %v1054_v47  ;;  %v1068_v18 = vadd.f32 %v1067_v59, %v1066_v46  ;;  %v1078_v19 = vmul.f32 %v1031_v28, %v1601_v11 }
  0xbb   :  { %v1075_v39 = vadd.f32 %v1071_v49, %v1065_v16  ;;  %v1080_v53 = vmul.f32 %v1653_v51, %v1601_v11  ;;  %v1081_v20 = vmul.f32 %v1031_v28, %v1596_v9  ;;  %v1092_v3 = vmul.f32 %v1047_v14, %v1581_v2 }
  0xbc   :  { %v1076_v63 = vadd.f32 %v1074_v34, %v1068_v18  ;;  %v1079_v22 = vsub.f32 %v1077_v17, %v1078_v19  ;;  %v1093_v12 = vmul.f32 %v1656_v54, %v1048_v21  ;;  %v1095_v57 = vmul.f32 %v1656_v54, %v1047_v14 }
  0xbd   :  { %v1082_v30 = vadd.f32 %v1081_v20, %v1080_v53  ;;  %v1096_v10 = vmul.f32 %v1048_v21, %v1581_v2  ;;  %v1098_v32 = vsub.f32 0.0, %v1031_v28  ;;  %v1099_v33 = vmul.f32 %v1061_v8, %v1651_v13 }
  0xbe   :  { %v1089_v61 = vadd.f32 %v1085_v29, %v1079_v22  ;;  %v1094_v36 = vsub.f32 %v1092_v3, %v1093_v12  ;;  %v1103_v11 = vmul.f32 %v1062_v15, %v1651_v13  ;;  %v1110_v9 = vmul.f32 %v1047_v14, %v1653_v51 }
  0xbf   :  { %v1090_v6 = vadd.f32 %v1088_v42, %v1082_v30  ;;  %v1097_v38 = vadd.f32 %v1096_v10, %v1095_v57  ;;  %v1100_v40 = vmul.f32 %v1098_v32, %v1062_v15  ;;  %v1102_v0 = vmul.f32 %v1098_v32, %v1061_v8 }
  0xc0   :  { %v1111_v58 = vmul.f32 %v1098_v32, %v1048_v21  ;;  %v1113_v60 = vmul.f32 %v1098_v32, %v1047_v14  ;;  %v1114_v23 = vmul.f32 %v1048_v21, %v1653_v51  ;;  %v1117_v41 = vmul.f32 %v1061_v8, %v1581_v2 }
  0xc1   :  { %v1101_v7 = vsub.f32 %v1099_v33, %v1100_v40  ;;  %v1104_v43 = vadd.f32 %v1103_v11, %v1102_v0  ;;  %v1118_v35 = vmul.f32 %v1658_v56, %v1062_v15  ;;  %v1120_v45 = vmul.f32 %v1658_v56, %v1061_v8 }
  0xc2   :  { %v1112_v44 = vsub.f32 %v1110_v9, %v1111_v58  ;;  %v1115_v47 = vadd.f32 %v1114_v23, %v1113_v60  ;;  %v1121_v49 = vmul.f32 %v1062_v15, %v1581_v2  ;;  %v1129_v28 = vmul.f32 %v1075_v39, %v1581_v2 }
  0xc3   :  { %v1105_v34 = vadd.f32 %v1101_v7, %v1094_v36  ;;  %v1106_v29 = vadd.f32 %v1104_v43, %v1097_v38  ;;  %v1119_v42 = vsub.f32 %v1117_v41, %v1118_v35  ;;  %v1130_v48 = vmul.f32 %v1656_v54, %v1076_v63 }
  0xc4   :  { %v1122_v62 = vadd.f32 %v1121_v49, %v1120_v45  ;;  %v1132_v50 = vmul.f32 %v1656_v54, %v1075_v39  ;;  %v1133_v52 = vmul.f32 %v1076_v63, %v1581_v2  ;;  %v1135_v4 = vmul.f32 %v1089_v61, %v1651_v13 }
  0xc5   :  { %1107 = vst [vmem:[%s1728_s4] sm:$0xff] %v1105_v34  ;;  %v1123_v37 = vadd.f32 %v1119_v42, %v1112_v44  ;;  %v1131_v24 = vsub.f32 %v1129_v28, %v1130_v48  ;;  %v1136_v25 = vmul.f32 %v1098_v32, %v1090_v6  ;;  %v1138_v5 = vmul.f32 %v1098_v32, %v1089_v61 }
  0xc6   :  { %1199 = vst [vmem:[%s1728_s4 + $0x20] sm:$0xff] %v1106_v29  ;;  %v1124_v55 = vadd.f32 %v1122_v62, %v1115_v47  ;;  %v1134_v27 = vadd.f32 %v1133_v52, %v1132_v50  ;;  %v1139_v54 = vmul.f32 %v1090_v6, %v1651_v13  ;;  %v1147_v26 = vmul.f32 %v1075_v39, %v1653_v51 }
  0xc7   :  { %1200 = vst [vmem:[%s1728_s4 + $0x8] sm:$0xff] %v1123_v37  ;;  %v1137_v31 = vsub.f32 %v1135_v4, %v1136_v25  ;;  %v1148_v1 = vmul.f32 %v1098_v32, %v1076_v63  ;;  %v1150_v46 = vmul.f32 %v1098_v32, %v1075_v39  ;;  %v1151_v59 = vmul.f32 %v1076_v63, %v1653_v51 }
  0xc8   :  { %1201 = vst [vmem:[%s1728_s4 + $0x28] sm:$0xff] %v1124_v55  ;;  %v1140_v14 = vadd.f32 %v1139_v54, %v1138_v5  ;;  %v1153_v21 = vmul.f32 %v1089_v61, %v1581_v2  ;;  %v1154_v13 = vmul.f32 %v1658_v56, %v1090_v6  ;;  %v1156_v16 = vmul.f32 %v1658_v56, %v1089_v61 }
  0xc9   :  { %v1141_v17 = vadd.f32 %v1137_v31, %v1131_v24  ;;  %v1149_v8 = vsub.f32 %v1147_v26, %v1148_v1  ;;  %v1152_v15 = vadd.f32 %v1151_v59, %v1150_v46  ;;  %v1157_v18 = vmul.f32 %v1090_v6, %v1581_v2 }
  0xca   :  { %v1142_v19 = vadd.f32 %v1140_v14, %v1134_v27  ;;  %v1155_v39 = vsub.f32 %v1153_v21, %v1154_v13 }
  0xcb   :  { %1202 = vst [vmem:[%s1728_s4 + $0x10] sm:$0xff] %v1141_v17  ;;  %v1158_v51 = vadd.f32 %v1157_v18, %v1156_v16 }
  0xcc   :  { %1203 = vst [vmem:[%s1728_s4 + $0x30] sm:$0xff] %v1142_v19  ;;  %v1159_v53 = vadd.f32 %v1155_v39, %v1149_v8 }
  0xcd   :  { %v1160_v20 = vadd.f32 %v1158_v51, %v1152_v15 }
  0xce   :  { %1204 = vst [vmem:[%s1728_s4 + $0x18] sm:$0xff] %v1159_v53 }
  0xcf   :  { %1205 = vst [vmem:[%s1728_s4 + $0x38] sm:$0xff] %v1160_v20 }
  0xd0   :  { %1169 = vsyncpa [#allocation3], 1 }
  0xd1   :  { %1170 = vsyncpa [#allocation5], 1 }

</bundles_post_ra>
